<compile_context>
chip_gen: v6e
topology: v6e:2x2x1
jax: 0.10.0
libtpu: 0.0.40
codegen_flags: <defaults>
</compile_context>

<pallas_src>
import functools

import jax
import jax.numpy as jnp
from jax.experimental import pallas as pl
from jax.experimental.pallas import tpu as pltpu


_VMEM_LIMIT = 48 * 1024 * 1024


def _round_up(x, m):
    return ((x + m - 1) // m) * m


def _pad_to(a, shape):
    pads = [(0, t - s) for s, t in zip(a.shape, shape)]
    if all(p == (0, 0) for p in pads):
        return a
    return jnp.pad(a, pads)


# ----------------------------------------------------------------------------
# Stage 1: token-blocked kernel (per (T, H) tile of tokens)
# ----------------------------------------------------------------------------
def _token_kernel(x_ref, dw_ref, db_ref, v_ref,
                  we1_ref, be1_ref, we2_ref, be2_ref,
                  wd1_ref, bd1_ref, wd2_ref, bd2_ref,
                  tnt_ref, kb_ref,
                  xbar_ref, p_ref, lg_ref, *, kappa):
    x = x_ref[...]                                      # (T, H) compute dtype
    cdt = x.dtype

    # attention-pooling logits: tanh(x @ W + b) . v
    # the final dot with v is a VPU lane-reduction (a 1-wide output tile would
    # waste a full MXU pass at 1/128..1/256 column utilization).
    t = jnp.tanh(
        jnp.dot(x, dw_ref[...], preferred_element_type=jnp.float32) + db_ref[...])
    lg_ref[...] = jnp.sum(t * v_ref[...], axis=-1, keepdims=True)       # (T, 1)

    # AE encoder + L2 normalize (rsqrt -> EUP slot)
    h1 = jnp.maximum(
        jnp.dot(x, we1_ref[...], preferred_element_type=jnp.float32) + be1_ref[...],
        0.0)
    z_raw = (jnp.dot(h1.astype(cdt), we2_ref[...],
                     preferred_element_type=jnp.float32) + be2_ref[...])
    z = z_raw * jax.lax.rsqrt(
        jnp.maximum(jnp.sum(z_raw * z_raw, axis=-1, keepdims=True), 1e-24))
    zc = z.astype(cdt)

    # AE decoder
    dh = jnp.maximum(
        jnp.dot(zc, wd1_ref[...], preferred_element_type=jnp.float32) + bd1_ref[...],
        0.0)
    xbar_ref[...] = (jnp.dot(dh.astype(cdt), wd2_ref[...],
                             preferred_element_type=jnp.float32) + bd2_ref[...])

    # cluster assignment; padded-cluster columns get a -1e30 bias (kb) so the
    # softmax over the 128-padded K axis matches the unpadded one exactly.
    sim = (jnp.dot(zc, tnt_ref[...], preferred_element_type=jnp.float32) * kappa
           + kb_ref[...])
    e = jnp.exp(sim - jnp.max(sim, axis=-1, keepdims=True))
    p_ref[...] = e / jnp.sum(e, axis=-1, keepdims=True)    # exact divide


def token_stage(x, w, kappa, tile_n):
    N, H = x.shape
    d1p = w["we1"].shape[1]
    d2p = w["we2"].shape[1]
    Kp = w["tnt"].shape[1]

    tile = min(tile_n, N)
    if tile < N:
        tile = min(N, max(128, (tile // 128) * 128))   # 128-row MXU/bf16 tiles
    grid = (pl.cdiv(N, tile),)
    const = lambda i: (0, 0)                           # weights resident

    return pl.pallas_call(
        functools.partial(_token_kernel, kappa=kappa),
        out_shape=(
            jax.ShapeDtypeStruct((N, H), jnp.float32),    # x_bar
            jax.ShapeDtypeStruct((N, Kp), jnp.float32),   # p_word (padded K)
            jax.ShapeDtypeStruct((N, 1), jnp.float32),    # attention logits
        ),
        grid=grid,
        in_specs=[
            pl.BlockSpec((tile, H), lambda i: (i, 0)),
            pl.BlockSpec((H, H), const),
            pl.BlockSpec((1, H), const),
            pl.BlockSpec((1, H), const),
            pl.BlockSpec((H, d1p), const),
            pl.BlockSpec((1, d1p), const),
            pl.BlockSpec((d1p, d2p), const),
            pl.BlockSpec((1, d2p), const),
            pl.BlockSpec((d2p, d1p), const),
            pl.BlockSpec((1, d1p), const),
            pl.BlockSpec((d1p, H), const),
            pl.BlockSpec((1, H), const),
            pl.BlockSpec((d2p, Kp), const),
            pl.BlockSpec((1, Kp), const),
        ],
        out_specs=(
            pl.BlockSpec((tile, H), lambda i: (i, 0)),
            pl.BlockSpec((tile, Kp), lambda i: (i, 0)),
            pl.BlockSpec((tile, 1), lambda i: (i, 0)),
        ),
        compiler_params=pltpu.CompilerParams(
            dimension_semantics=("parallel",),
            vmem_limit_bytes=_VMEM_LIMIT),
    )(x, w["dense_w"], w["dense_b"], w["v"],
      w["we1"], w["be1"], w["we2"], w["be2"],
      w["wd1"], w["bd1"], w["wd2"], w["bd2"],
      w["tnt"], w["kbias"])


# ----------------------------------------------------------------------------
# Stage 2: document pooling kernel (docs_per_block docs per grid step)
#   avg_doc_emb = sum(mask * h) / max(valid_num, 1)
#   doc_emb     = softmax(masked attn logits) @ h
# ----------------------------------------------------------------------------
def _doc_pool_kernel(h_ref, m_ref, lg_ref, avg_ref, doc_ref):
    db = h_ref.shape[0]
    for d in range(db):                 # static unroll; db is small (<=4)
        h = h_ref[d]                    # (S, H) compute dtype
        m = m_ref[d]                    # (1, S) f32 mask (CLS already zeroed)
        lg = lg_ref[d]                  # (1, S) f32 precomputed logits

        # average doc embedding (guard against all-masked docs)
        msum = jnp.dot(m.astype(h.dtype), h, preferred_element_type=jnp.float32)
        valid = jnp.maximum(jnp.sum(m, axis=-1, keepdims=True), 1.0)
        avg_ref[d] = msum / valid

        # attention pooling: masked lane-dense softmax, weighted sum
        lg_m = jnp.where(m > 0.0, lg, -1e30)
        e = jnp.exp(lg_m - jnp.max(lg_m, axis=-1, keepdims=True))
        attn = e / jnp.maximum(jnp.sum(e, axis=-1, keepdims=True), 1e-30)
        doc_ref[d] = jnp.dot(attn.astype(h.dtype), h,
                             preferred_element_type=jnp.float32)


def doc_pool_stage(h, mask3, logits3, docs_per_block):
    B, S, H = h.shape
    db = min(docs_per_block, B)
    grid = (pl.cdiv(B, db),)
    avg, doc = pl.pallas_call(
        _doc_pool_kernel,
        out_shape=(
            jax.ShapeDtypeStruct((B, 1, H), jnp.float32),
            jax.ShapeDtypeStruct((B, 1, H), jnp.float32),
        ),
        grid=grid,
        in_specs=[
            pl.BlockSpec((db, S, H), lambda b: (b, 0, 0)),
            pl.BlockSpec((db, 1, S), lambda b: (b, 0, 0)),
            pl.BlockSpec((db, 1, S), lambda b: (b, 0, 0)),
        ],
        out_specs=(
            pl.BlockSpec((db, 1, H), lambda b: (b, 0, 0)),
            pl.BlockSpec((db, 1, H), lambda b: (b, 0, 0)),
        ),
        compiler_params=pltpu.CompilerParams(
            dimension_semantics=("parallel",),
            vmem_limit_bytes=_VMEM_LIMIT),
    )(h, mask3, logits3)
    return avg.reshape(B, H), doc.reshape(B, H)


# ----------------------------------------------------------------------------
# Stage 3: batched doc-level encoder + clustering + reconstruction
#   (single un-gridded call; dec_topic computed once for the whole batch)
# ----------------------------------------------------------------------------
def _doc_batch_kernel(d_ref, we1_ref, be1_ref, we2_ref, be2_ref,
                      wd1_ref, bd1_ref, wd2_ref, bd2_ref,
                      tn_ref, tnt_ref, kb_ref, rec_ref, *, kappa):
    we1 = we1_ref[...]
    cdt = we1.dtype
    d = d_ref[...].astype(cdt)                              # (B, H)

    # doc-level encoder (decoded x_bar_doc is discarded by the module -> skip)
    h1 = jnp.maximum(
        jnp.dot(d, we1, preferred_element_type=jnp.float32) + be1_ref[...], 0.0)
    z_raw = (jnp.dot(h1.astype(cdt), we2_ref[...],
                     preferred_element_type=jnp.float32) + be2_ref[...])
    z = z_raw * jax.lax.rsqrt(
        jnp.maximum(jnp.sum(z_raw * z_raw, axis=-1, keepdims=True), 1e-24))

    # p_doc = softmax(z @ tn.T * kappa) over the 128-padded K axis
    sim = (jnp.dot(z.astype(cdt), tnt_ref[...],
                   preferred_element_type=jnp.float32) * kappa + kb_ref[...])
    e = jnp.exp(sim - jnp.max(sim, axis=-1, keepdims=True))
    p_doc = e / jnp.sum(e, axis=-1, keepdims=True)          # (B, Kp), exact

    # dec_topic = decoder(normalized topic_emb): computed ONCE here (hoisted
    # out of the per-doc grid); padded topic rows are killed by p_doc == 0.
    dh = jnp.maximum(
        jnp.dot(tn_ref[...], wd1_ref[...], preferred_element_type=jnp.float32)
        + bd1_ref[...], 0.0)
    dec_topic = (jnp.dot(dh.astype(cdt), wd2_ref[...],
                         preferred_element_type=jnp.float32) + bd2_ref[...])

    rec_ref[...] = jnp.dot(p_doc, dec_topic, preferred_element_type=jnp.float32)


def doc_batch_stage(doc_emb, w, kappa):
    B, H = doc_emb.shape
    return pl.pallas_call(
        functools.partial(_doc_batch_kernel, kappa=kappa),
        out_shape=jax.ShapeDtypeStruct((B, H), jnp.float32),
    )(doc_emb, w["we1"], w["be1"], w["we2"], w["be2"],
      w["wd1"], w["bd1"], w["wd2"], w["bd2"],
      w["tn"], w["tnt"], w["kbias"])


# ----------------------------------------------------------------------------
# Full forward (clustering mode, pretrain=False)
# ----------------------------------------------------------------------------
def _prepare_weights(params, compute_dtype):
    f32 = jnp.float32
    cd = compute_dtype
    H = params["we1"].shape[0]
    d1 = params["we1"].shape[1]
    d2 = params["we2"].shape[1]
    K = params["topic_emb"].shape[0]
    d1p, d2p, Kp = _round_up(d1, 128), _round_up(d2, 128), _round_up(K, 128)

    te = _pad_to(params["topic_emb"].astype(f32), (Kp, d2p))
    tn_f32 = te / jnp.maximum(jnp.linalg.norm(te, axis=-1, keepdims=True), 1e-12)

    w = {
        "dense_w": params["dense_w"].astype(cd),
        "dense_b": params["dense_b"].reshape(1, H).astype(f32),
        "v": params["v"].reshape(1, H).astype(f32),
        "we1": _pad_to(params["we1"].astype(f32), (H, d1p)).astype(cd),
        "be1": _pad_to(params["be1"].astype(f32), (d1p,)).reshape(1, d1p),
        "we2": _pad_to(params["we2"].astype(f32), (d1p, d2p)).astype(cd),
        "be2": _pad_to(params["be2"].astype(f32), (d2p,)).reshape(1, d2p),
        "wd1": _pad_to(params["wd1"].astype(f32), (d2p, d1p)).astype(cd),
        "bd1": _pad_to(params["bd1"].astype(f32), (d1p,)).reshape(1, d1p),
        "wd2": _pad_to(params["wd2"].astype(f32), (d1p, H)).astype(cd),
        "bd2": params["bd2"].reshape(1, H).astype(f32),
        "tn": tn_f32.astype(cd),
        "tnt": tn_f32.T.astype(cd),
        "kbias": jnp.where(jnp.arange(Kp) < K, 0.0, -1e30)
                   .astype(f32).reshape(1, Kp),
    }
    return w, K


def topclus_forward(last_hidden, attention_mask, valid_pos, params, kappa, *,
                    compute_dtype=jnp.bfloat16, tile_n=512, docs_per_block=4):
    B, S, H = last_hidden.shape
    N = B * S

    # attention_mask[:, 0] = 0  (functional: CLS excluded from pooling)
    mask = attention_mask.at[:, 0].set(0)
    mask3 = mask.astype(jnp.float32).reshape(B, 1, S)

    # weights: padded to lane multiples, topic_emb normalized/transposed once,
    # matmul operands cast to the compute dtype (bf16 by default).
    w, K = _prepare_weights(params, compute_dtype)

    lh_c = last_hidden.astype(compute_dtype)

    # Stage 1: token-blocked AE + cluster assign + pooled-attention logits.
    x_bar, p_word_p, tok_logits = token_stage(
        lh_c.reshape(N, H), w, kappa, tile_n)
    p_word = p_word_p[:, :K]
    logits3 = tok_logits.reshape(B, 1, S)

    # Stage 2: per-doc pooling only.
    avg_doc_emb, doc_emb = doc_pool_stage(lh_c, mask3, logits3, docs_per_block)

    # Stage 3: batched doc-level encoder / clustering / reconstruction.
    rec_doc_emb = doc_batch_stage(doc_emb, w, kappa)

    input_embs = last_hidden.reshape(N, H)
    word_valid = (valid_pos != 0).reshape(N)
    return avg_doc_emb, input_embs, x_bar, rec_doc_emb, p_word, word_valid


# ----------------------------------------------------------------------------
# Pure-JAX reference (for correctness check)
# ----------------------------------------------------------------------------
def _normalize(x):
    return x / jnp.maximum(jnp.linalg.norm(x, axis=-1, keepdims=True), 1e-12)


def _ae_ref(x, p):
    h1 = jax.nn.relu(x @ p["we1"] + p["be1"])
    z = _normalize(h1 @ p["we2"] + p["be2"])
    d1 = jax.nn.relu(z @ p["wd1"] + p["bd1"])
    return d1 @ p["wd2"] + p["bd2"], z


def topclus_forward_ref(last_hidden, attention_mask, valid_pos, p, kappa):
    B, S, H = last_hidden.shape
    mask = attention_mask.at[:, 0].set(0).astype(jnp.float32)
    sum_emb = jnp.einsum("bs,bsh->bh", mask, last_hidden)
    avg = sum_emb / jnp.sum(mask, axis=-1, keepdims=True)
    t = jnp.tanh(last_hidden @ p["dense_w"] + p["dense_b"])
    logits = jnp.einsum("bsh,h->bs", t, p["v"])
    logits = jnp.where(mask == 0.0, -jnp.inf, logits)
    attn = jax.nn.softmax(logits, axis=-1)
    doc = jnp.einsum("bs,bsh->bh", attn, last_hidden)
    input_embs = last_hidden.reshape(B * S, H)
    output_embs, z_word = _ae_ref(input_embs, p)
    _, z_doc = _ae_ref(doc, p)
    tn = _normalize(p["topic_emb"])
    p_doc = jax.nn.softmax(z_doc @ tn.T * kappa, axis=-1)
    p_word = jax.nn.softmax(z_word @ tn.T * kappa, axis=-1)
    d1 = jax.nn.relu(tn @ p["wd1"] + p["bd1"])
    dec_topic = d1 @ p["wd2"] + p["bd2"]
    rec_doc = p_doc @ dec_topic
    return avg, input_embs, output_embs, rec_doc, p_word


# ----------------------------------------------------------------------------
# Deterministic parameter init (shapes follow TopClusModel.__init__)
# ----------------------------------------------------------------------------
def init_params(key, input_dim, hidden_dims, n_clusters):
    d0, d1, d2 = input_dim, hidden_dims[0], hidden_dims[1]
    keys = jax.random.split(key, 12)
    s = lambda fi, fo: (2.0 / (fi + fo)) ** 0.5
    return {
        # AE encoder: Linear(d0->d1)+ReLU, Linear(d1->d2)
        "we1": jax.random.normal(keys[0], (d0, d1), jnp.float32) * s(d0, d1),
        "be1": jax.random.normal(keys[1], (d1,), jnp.float32) * 0.01,
        "we2": jax.random.normal(keys[2], (d1, d2), jnp.float32) * s(d1, d2),
        "be2": jax.random.normal(keys[3], (d2,), jnp.float32) * 0.01,
        # AE decoder: Linear(d2->d1)+ReLU, Linear(d1->d0)
        "wd1": jax.random.normal(keys[4], (d2, d1), jnp.float32) * s(d2, d1),
        "bd1": jax.random.normal(keys[5], (d1,), jnp.float32) * 0.01,
        "wd2": jax.random.normal(keys[6], (d1, d0), jnp.float32) * s(d1, d0),
        "bd2": jax.random.normal(keys[7], (d0,), jnp.float32) * 0.01,
        # attention-pooling dense + v (bert.config.hidden_size == input_dim)
        "dense_w": jax.random.normal(keys[8], (d0, d0), jnp.float32) * s(d0, d0),
        "dense_b": jax.random.normal(keys[9], (d0,), jnp.float32) * 0.01,
        "v": jax.random.uniform(keys[10], (d0,), jnp.float32),
        # topic_emb: xavier_normal_
        "topic_emb": jax.random.normal(keys[11], (n_clusters, d2), jnp.float32)
                     * s(n_clusters, d2),
    }


if __name__ == "__main__":
    # Small but non-trivial: exercises a 2-tile token grid (N = 256, tile 128)
    # and the 128-padding of d1/d2/K (48/24/10 -> 128/128/128).
    B, S, H = 2, 128, 32
    hidden_dims = [48, 24]
    n_clusters = 10
    kappa = 10.0

    key = jax.random.PRNGKey(0)
    k_p, k_h, k_v = jax.random.split(key, 3)
    params = init_params(k_p, H, hidden_dims, n_clusters)

    # stand-in for frozen BERT last_hidden_states
    last_hidden = jax.random.normal(k_h, (B, S, H), jnp.float32)
    attention_mask = jnp.ones((B, S), jnp.int32).at[:, -3:].set(0)
    valid_pos = (jax.random.uniform(k_v, (B, S)) > 0.4).astype(jnp.int32).at[:, 0].set(0)

    refs = topclus_forward_ref(last_hidden, attention_mask, valid_pos, params, kappa)
    names = ("avg_doc_emb", "input_embs", "output_embs", "rec_doc_emb", "p_word")

    # f32 compute path: tight check of kernel semantics.
    outs_f32 = topclus_forward(last_hidden, attention_mask, valid_pos, params,
                               kappa, compute_dtype=jnp.float32, tile_n=128)
    outs_f32 = jax.block_until_ready(outs_f32)
    for name, got, ref in zip(names, outs_f32[:5], refs):
        assert got.shape == ref.shape, (name, got.shape, ref.shape)
        assert jnp.allclose(got, ref, atol=3e-3, rtol=3e-3), f"f32 mismatch: {name}"

    # bf16-MXU production path: loose tolerance (bf16 operand rounding).
    outs_bf16 = topclus_forward(last_hidden, attention_mask, valid_pos, params,
                                kappa, compute_dtype=jnp.bfloat16, tile_n=128)
    outs_bf16 = jax.block_until_ready(outs_bf16)
    for name, got, ref in zip(names, outs_bf16[:5], refs):
        assert got.shape == ref.shape, (name, got.shape, ref.shape)
        assert jnp.allclose(got, ref, atol=6e-2, rtol=6e-2), f"bf16 mismatch: {name}"

    print("KERNEL_OK")
</pallas_src>

<mosaic_0001>
module attributes {stable_mosaic.version = 11 : i64} {
  func.func @_token_kernel(%arg0: i32, %arg1: memref<128x32xf32, #tpu.memory_space<vmem>>, %arg2: memref<32x32xf32, #tpu.memory_space<vmem>>, %arg3: memref<1x32xf32, #tpu.memory_space<vmem>>, %arg4: memref<1x32xf32, #tpu.memory_space<vmem>>, %arg5: memref<32x128xf32, #tpu.memory_space<vmem>>, %arg6: memref<1x128xf32, #tpu.memory_space<vmem>>, %arg7: memref<128x128xf32, #tpu.memory_space<vmem>>, %arg8: memref<1x128xf32, #tpu.memory_space<vmem>>, %arg9: memref<128x128xf32, #tpu.memory_space<vmem>>, %arg10: memref<1x128xf32, #tpu.memory_space<vmem>>, %arg11: memref<128x32xf32, #tpu.memory_space<vmem>>, %arg12: memref<1x32xf32, #tpu.memory_space<vmem>>, %arg13: memref<128x128xf32, #tpu.memory_space<vmem>>, %arg14: memref<1x128xf32, #tpu.memory_space<vmem>>, %arg15: memref<128x32xf32, #tpu.memory_space<vmem>>, %arg16: memref<128x128xf32, #tpu.memory_space<vmem>>, %arg17: memref<128x1xf32, #tpu.memory_space<vmem>>) attributes {dimension_semantics = [#tpu.dimension_semantics<parallel>], iteration_bounds = array<i64: 2>, scalar_prefetch = 0 : i64, scratch_operands = 0 : i64, tpu.core_type = #tpu.core_type<tc>, window_params = [{transform_indices = @transform_0, window_bounds = array<i64: 128, 32>}, {pipeline_mode = #tpu.pipeline_mode<synchronous>, transform_indices = @transform_1, window_bounds = array<i64: 32, 32>}, {pipeline_mode = #tpu.pipeline_mode<synchronous>, transform_indices = @transform_2, window_bounds = array<i64: 1, 32>}, {pipeline_mode = #tpu.pipeline_mode<synchronous>, transform_indices = @transform_3, window_bounds = array<i64: 1, 32>}, {pipeline_mode = #tpu.pipeline_mode<synchronous>, transform_indices = @transform_4, window_bounds = array<i64: 32, 128>}, {pipeline_mode = #tpu.pipeline_mode<synchronous>, transform_indices = @transform_5, window_bounds = array<i64: 1, 128>}, {pipeline_mode = #tpu.pipeline_mode<synchronous>, transform_indices = @transform_6, window_bounds = array<i64: 128, 128>}, {pipeline_mode = #tpu.pipeline_mode<synchronous>, transform_indices = @transform_7, window_bounds = array<i64: 1, 128>}, {pipeline_mode = #tpu.pipeline_mode<synchronous>, transform_indices = @transform_8, window_bounds = array<i64: 128, 128>}, {pipeline_mode = #tpu.pipeline_mode<synchronous>, transform_indices = @transform_9, window_bounds = array<i64: 1, 128>}, {pipeline_mode = #tpu.pipeline_mode<synchronous>, transform_indices = @transform_10, window_bounds = array<i64: 128, 32>}, {pipeline_mode = #tpu.pipeline_mode<synchronous>, transform_indices = @transform_11, window_bounds = array<i64: 1, 32>}, {pipeline_mode = #tpu.pipeline_mode<synchronous>, transform_indices = @transform_12, window_bounds = array<i64: 128, 128>}, {pipeline_mode = #tpu.pipeline_mode<synchronous>, transform_indices = @transform_13, window_bounds = array<i64: 1, 128>}, {transform_indices = @transform_14, window_bounds = array<i64: 128, 32>}, {transform_indices = @transform_15, window_bounds = array<i64: 128, 128>}, {transform_indices = @transform_16, window_bounds = array<i64: 128, 1>}]} {
    %c0 = arith.constant 0 : index
    %c0_0 = arith.constant 0 : index
    %0 = vector.load %arg1[%c0, %c0_0] : memref<128x32xf32, #tpu.memory_space<vmem>>, vector<128x32xf32>
    %c0_1 = arith.constant 0 : index
    %c0_2 = arith.constant 0 : index
    %1 = vector.load %arg2[%c0_1, %c0_2] : memref<32x32xf32, #tpu.memory_space<vmem>>, vector<32x32xf32>
    %cst = arith.constant dense<0.000000e+00> : vector<128x32xf32>
    %2 = tpu.matmul %0, %1, %cst {dimension_numbers = #tpu.dot_dimension_numbers<[1], [0], [0], [1], [0, 0, 1, 1], [], []>} : vector<128x32xf32>, vector<32x32xf32>, vector<128x32xf32> -> vector<128x32xf32>
    %c0_3 = arith.constant 0 : index
    %c0_4 = arith.constant 0 : index
    %3 = vector.load %arg3[%c0_3, %c0_4] : memref<1x32xf32, #tpu.memory_space<vmem>>, vector<1x32xf32>
    %4 = vector.broadcast %3 : vector<1x32xf32> to vector<128x32xf32>
    %5 = arith.addf %2, %4 : vector<128x32xf32>
    %6 = math.tanh %5 : vector<128x32xf32>
    %c0_5 = arith.constant 0 : index
    %c0_6 = arith.constant 0 : index
    %7 = vector.load %arg4[%c0_5, %c0_6] : memref<1x32xf32, #tpu.memory_space<vmem>>, vector<1x32xf32>
    %8 = vector.broadcast %7 : vector<1x32xf32> to vector<128x32xf32>
    %9 = arith.mulf %6, %8 : vector<128x32xf32>
    %cst_7 = arith.constant dense<0.000000e+00> : vector<128xf32>
    %10 = vector.multi_reduction <add>, %9, %cst_7 [1] : vector<128x32xf32> to vector<128xf32>
    %11 = vector.shape_cast %10 : vector<128xf32> to vector<128x1xf32>
    %c0_8 = arith.constant 0 : index
    %c0_9 = arith.constant 0 : index
    %12 = vector.load %arg17[%c0_8, %c0_9] : memref<128x1xf32, #tpu.memory_space<vmem>>, vector<128x1xf32>
    tpu.vector_store %arg17[%c0_8, %c0_9], %11 {strides = array<i32>} : memref<128x1xf32, #tpu.memory_space<vmem>>, vector<128x1xf32>,
    %c0_10 = arith.constant 0 : index
    %c0_11 = arith.constant 0 : index
    %13 = vector.load %arg5[%c0_10, %c0_11] : memref<32x128xf32, #tpu.memory_space<vmem>>, vector<32x128xf32>
    %cst_12 = arith.constant dense<0.000000e+00> : vector<128x128xf32>
    %14 = tpu.matmul %0, %13, %cst_12 {dimension_numbers = #tpu.dot_dimension_numbers<[1], [0], [0], [1], [0, 0, 1, 1], [], []>} : vector<128x32xf32>, vector<32x128xf32>, vector<128x128xf32> -> vector<128x128xf32>
    %c0_13 = arith.constant 0 : index
    %c0_14 = arith.constant 0 : index
    %15 = vector.load %arg6[%c0_13, %c0_14] : memref<1x128xf32, #tpu.memory_space<vmem>>, vector<1x128xf32>
    %16 = vector.broadcast %15 : vector<1x128xf32> to vector<128x128xf32>
    %17 = arith.addf %14, %16 : vector<128x128xf32>
    %cst_15 = arith.constant 0.000000e+00 : f32
    %18 = vector.broadcast %cst_15 : f32 to vector<128x128xf32>
    %19 = arith.maximumf %17, %18 : vector<128x128xf32>
    %c0_16 = arith.constant 0 : index
    %c0_17 = arith.constant 0 : index
    %20 = vector.load %arg7[%c0_16, %c0_17] : memref<128x128xf32, #tpu.memory_space<vmem>>, vector<128x128xf32>
    %cst_18 = arith.constant dense<0.000000e+00> : vector<128x128xf32>
    %21 = tpu.matmul %19, %20, %cst_18 {dimension_numbers = #tpu.dot_dimension_numbers<[1], [0], [0], [1], [0, 0, 1, 1], [], []>} : vector<128x128xf32>, vector<128x128xf32>, vector<128x128xf32> -> vector<128x128xf32>
    %c0_19 = arith.constant 0 : index
    %c0_20 = arith.constant 0 : index
    %22 = vector.load %arg8[%c0_19, %c0_20] : memref<1x128xf32, #tpu.memory_space<vmem>>, vector<1x128xf32>
    %23 = vector.broadcast %22 : vector<1x128xf32> to vector<128x128xf32>
    %24 = arith.addf %21, %23 : vector<128x128xf32>
    %25 = arith.mulf %24, %24 : vector<128x128xf32>
    %cst_21 = arith.constant dense<0.000000e+00> : vector<128xf32>
    %26 = vector.multi_reduction <add>, %25, %cst_21 [1] : vector<128x128xf32> to vector<128xf32>
    %27 = vector.shape_cast %26 : vector<128xf32> to vector<128x1xf32>
    %cst_22 = arith.constant 1.000000e-24 : f32
    %28 = vector.broadcast %cst_22 : f32 to vector<128x1xf32>
    %29 = arith.maximumf %27, %28 : vector<128x1xf32>
    %30 = math.rsqrt %29 : vector<128x1xf32>
    %31 = vector.broadcast %30 : vector<128x1xf32> to vector<128x128xf32>
    %32 = arith.mulf %24, %31 : vector<128x128xf32>
    %c0_23 = arith.constant 0 : index
    %c0_24 = arith.constant 0 : index
    %33 = vector.load %arg9[%c0_23, %c0_24] : memref<128x128xf32, #tpu.memory_space<vmem>>, vector<128x128xf32>
    %cst_25 = arith.constant dense<0.000000e+00> : vector<128x128xf32>
    %34 = tpu.matmul %32, %33, %cst_25 {dimension_numbers = #tpu.dot_dimension_numbers<[1], [0], [0], [1], [0, 0, 1, 1], [], []>} : vector<128x128xf32>, vector<128x128xf32>, vector<128x128xf32> -> vector<128x128xf32>
    %c0_26 = arith.constant 0 : index
    %c0_27 = arith.constant 0 : index
    %35 = vector.load %arg10[%c0_26, %c0_27] : memref<1x128xf32, #tpu.memory_space<vmem>>, vector<1x128xf32>
    %36 = vector.broadcast %35 : vector<1x128xf32> to vector<128x128xf32>
    %37 = arith.addf %34, %36 : vector<128x128xf32>
    %cst_28 = arith.constant 0.000000e+00 : f32
    %38 = vector.broadcast %cst_28 : f32 to vector<128x128xf32>
    %39 = arith.maximumf %37, %38 : vector<128x128xf32>
    %c0_29 = arith.constant 0 : index
    %c0_30 = arith.constant 0 : index
    %40 = vector.load %arg11[%c0_29, %c0_30] : memref<128x32xf32, #tpu.memory_space<vmem>>, vector<128x32xf32>
    %cst_31 = arith.constant dense<0.000000e+00> : vector<128x32xf32>
    %41 = tpu.matmul %39, %40, %cst_31 {dimension_numbers = #tpu.dot_dimension_numbers<[1], [0], [0], [1], [0, 0, 1, 1], [], []>} : vector<128x128xf32>, vector<128x32xf32>, vector<128x32xf32> -> vector<128x32xf32>
    %c0_32 = arith.constant 0 : index
    %c0_33 = arith.constant 0 : index
    %42 = vector.load %arg12[%c0_32, %c0_33] : memref<1x32xf32, #tpu.memory_space<vmem>>, vector<1x32xf32>
    %43 = vector.broadcast %42 : vector<1x32xf32> to vector<128x32xf32>
    %44 = arith.addf %41, %43 : vector<128x32xf32>
    %c0_34 = arith.constant 0 : index
    %c0_35 = arith.constant 0 : index
    %45 = vector.load %arg15[%c0_34, %c0_35] : memref<128x32xf32, #tpu.memory_space<vmem>>, vector<128x32xf32>
    tpu.vector_store %arg15[%c0_34, %c0_35], %44 {strides = array<i32>} : memref<128x32xf32, #tpu.memory_space<vmem>>, vector<128x32xf32>,
    %c0_36 = arith.constant 0 : index
    %c0_37 = arith.constant 0 : index
    %46 = vector.load %arg13[%c0_36, %c0_37] : memref<128x128xf32, #tpu.memory_space<vmem>>, vector<128x128xf32>
    %cst_38 = arith.constant dense<0.000000e+00> : vector<128x128xf32>
    %47 = tpu.matmul %32, %46, %cst_38 {dimension_numbers = #tpu.dot_dimension_numbers<[1], [0], [0], [1], [0, 0, 1, 1], [], []>} : vector<128x128xf32>, vector<128x128xf32>, vector<128x128xf32> -> vector<128x128xf32>
    %cst_39 = arith.constant 1.000000e+01 : f32
    %48 = vector.broadcast %cst_39 : f32 to vector<128x128xf32>
    %49 = arith.mulf %47, %48 : vector<128x128xf32>
    %c0_40 = arith.constant 0 : index
    %c0_41 = arith.constant 0 : index
    %50 = vector.load %arg14[%c0_40, %c0_41] : memref<1x128xf32, #tpu.memory_space<vmem>>, vector<1x128xf32>
    %51 = vector.broadcast %50 : vector<1x128xf32> to vector<128x128xf32>
    %52 = arith.addf %49, %51 : vector<128x128xf32>
    %cst_42 = arith.constant dense<0xFF800000> : vector<128xf32>
    %53 = vector.multi_reduction <maximumf>, %52, %cst_42 [1] : vector<128x128xf32> to vector<128xf32>
    %54 = vector.shape_cast %53 : vector<128xf32> to vector<128x1xf32>
    %55 = vector.broadcast %54 : vector<128x1xf32> to vector<128x128xf32>
    %56 = arith.subf %52, %55 : vector<128x128xf32>
    %57 = math.exp %56 : vector<128x128xf32>
    %cst_43 = arith.constant dense<0.000000e+00> : vector<128xf32>
    %58 = vector.multi_reduction <add>, %57, %cst_43 [1] : vector<128x128xf32> to vector<128xf32>
    %59 = vector.shape_cast %58 : vector<128xf32> to vector<128x1xf32>
    %60 = vector.broadcast %59 : vector<128x1xf32> to vector<128x128xf32>
    %61 = arith.divf %57, %60 : vector<128x128xf32>
    %c0_44 = arith.constant 0 : index
    %c0_45 = arith.constant 0 : index
    %62 = vector.load %arg16[%c0_44, %c0_45] : memref<128x128xf32, #tpu.memory_space<vmem>>, vector<128x128xf32>
    tpu.vector_store %arg16[%c0_44, %c0_45], %61 {strides = array<i32>} : memref<128x128xf32, #tpu.memory_space<vmem>>, vector<128x128xf32>,
    return
  }
  func.func @transform_0(%arg0: i32) -> (i32, i32) {
    %c0_i32 = arith.constant 0 : i32
    %c0_i32_0 = arith.constant 0 : i32
    return %arg0, %c0_i32 : i32, i32
  }
  func.func @transform_1(%arg0: i32) -> (i32, i32) {
    %c0_i32 = arith.constant 0 : i32
    %c0_i32_0 = arith.constant 0 : i32
    %c0_i32_1 = arith.constant 0 : i32
    return %c0_i32, %c0_i32_0 : i32, i32
  }
  func.func @transform_2(%arg0: i32) -> (i32, i32) {
    %c0_i32 = arith.constant 0 : i32
    %c0_i32_0 = arith.constant 0 : i32
    %c0_i32_1 = arith.constant 0 : i32
    return %c0_i32, %c0_i32_0 : i32, i32
  }
  func.func @transform_3(%arg0: i32) -> (i32, i32) {
    %c0_i32 = arith.constant 0 : i32
    %c0_i32_0 = arith.constant 0 : i32
    %c0_i32_1 = arith.constant 0 : i32
    return %c0_i32, %c0_i32_0 : i32, i32
  }
  func.func @transform_4(%arg0: i32) -> (i32, i32) {
    %c0_i32 = arith.constant 0 : i32
    %c0_i32_0 = arith.constant 0 : i32
    %c0_i32_1 = arith.constant 0 : i32
    return %c0_i32, %c0_i32_0 : i32, i32
  }
  func.func @transform_5(%arg0: i32) -> (i32, i32) {
    %c0_i32 = arith.constant 0 : i32
    %c0_i32_0 = arith.constant 0 : i32
    %c0_i32_1 = arith.constant 0 : i32
    return %c0_i32, %c0_i32_0 : i32, i32
  }
  func.func @transform_6(%arg0: i32) -> (i32, i32) {
    %c0_i32 = arith.constant 0 : i32
    %c0_i32_0 = arith.constant 0 : i32
    %c0_i32_1 = arith.constant 0 : i32
    return %c0_i32, %c0_i32_0 : i32, i32
  }
  func.func @transform_7(%arg0: i32) -> (i32, i32) {
    %c0_i32 = arith.constant 0 : i32
    %c0_i32_0 = arith.constant 0 : i32
    %c0_i32_1 = arith.constant 0 : i32
    return %c0_i32, %c0_i32_0 : i32, i32
  }
  func.func @transform_8(%arg0: i32) -> (i32, i32) {
    %c0_i32 = arith.constant 0 : i32
    %c0_i32_0 = arith.constant 0 : i32
    %c0_i32_1 = arith.constant 0 : i32
    return %c0_i32, %c0_i32_0 : i32, i32
  }
  func.func @transform_9(%arg0: i32) -> (i32, i32) {
    %c0_i32 = arith.constant 0 : i32
    %c0_i32_0 = arith.constant 0 : i32
    %c0_i32_1 = arith.constant 0 : i32
    return %c0_i32, %c0_i32_0 : i32, i32
  }
  func.func @transform_10(%arg0: i32) -> (i32, i32) {
    %c0_i32 = arith.constant 0 : i32
    %c0_i32_0 = arith.constant 0 : i32
    %c0_i32_1 = arith.constant 0 : i32
    return %c0_i32, %c0_i32_0 : i32, i32
  }
  func.func @transform_11(%arg0: i32) -> (i32, i32) {
    %c0_i32 = arith.constant 0 : i32
    %c0_i32_0 = arith.constant 0 : i32
    %c0_i32_1 = arith.constant 0 : i32
    return %c0_i32, %c0_i32_0 : i32, i32
  }
  func.func @transform_12(%arg0: i32) -> (i32, i32) {
    %c0_i32 = arith.constant 0 : i32
    %c0_i32_0 = arith.constant 0 : i32
    %c0_i32_1 = arith.constant 0 : i32
    return %c0_i32, %c0_i32_0 : i32, i32
  }
  func.func @transform_13(%arg0: i32) -> (i32, i32) {
    %c0_i32 = arith.constant 0 : i32
    %c0_i32_0 = arith.constant 0 : i32
    %c0_i32_1 = arith.constant 0 : i32
    return %c0_i32, %c0_i32_0 : i32, i32
  }
  func.func @transform_14(%arg0: i32) -> (i32, i32) {
    %c0_i32 = arith.constant 0 : i32
    %c0_i32_0 = arith.constant 0 : i32
    return %arg0, %c0_i32 : i32, i32
  }
  func.func @transform_15(%arg0: i32) -> (i32, i32) {
    %c0_i32 = arith.constant 0 : i32
    %c0_i32_0 = arith.constant 0 : i32
    return %arg0, %c0_i32 : i32, i32
  }
  func.func @transform_16(%arg0: i32) -> (i32, i32) {
    %c0_i32 = arith.constant 0 : i32
    %c0_i32_0 = arith.constant 0 : i32
    return %arg0, %c0_i32 : i32, i32
  }
}

</mosaic_0001>

<bundles_post_ra>
// kernel: tpu_custom_call.1
= control target key start
LH: loop header
LB: loop body
LE: loop exit
PB: predicated region body
PF: predicated region fallthrough
CT: control target
= control target key end

     0   :  { %s3921_s0 = inlined_call_operand.vmem [shape: f32[256,32], index: 0, kind: input, shape index: {}]   ;;  %s3922_s1 = inlined_call_operand.vmem [shape: f32[32,32], index: 1, kind: input, shape index: {}]   ;;  %s3923_s2 = inlined_call_operand.vmem [shape: f32[1,32], index: 2, kind: input, shape index: {}]   ;;  %s3924_s3 = inlined_call_operand.vmem [shape: f32[1,32], index: 3, kind: input, shape index: {}]   ;;  %s3925_s4 = inlined_call_operand.vmem [shape: f32[32,128], index: 4, kind: input, shape index: {}]   ;;  %s3926_s5 = inlined_call_operand.vmem [shape: f32[1,128], index: 5, kind: input, shape index: {}]   ;;  %s3927_s6 = inlined_call_operand.vmem [shape: f32[128,128], index: 6, kind: input, shape index: {}]   ;;  %s3928_s7 = inlined_call_operand.vmem [shape: f32[1,128], index: 7, kind: input, shape index: {}]   ;;  %s3929_s8 = inlined_call_operand.vmem [shape: f32[128,128], index: 8, kind: input, shape index: {}]   ;;  %s3930_s9 = inlined_call_operand.vmem [shape: f32[1,128], index: 9, kind: input, shape index: {}]   ;;  %s3931_s10 = inlined_call_operand.vmem [shape: f32[128,32], index: 10, kind: input, shape index: {}]   ;;  %s3932_s11 = inlined_call_operand.vmem [shape: f32[1,32], index: 11, kind: input, shape index: {}]   ;;  %s3933_s12 = inlined_call_operand.vmem [shape: f32[128,128], index: 12, kind: input, shape index: {}]   ;;  %s3934_s13 = inlined_call_operand.vmem [shape: f32[1,128], index: 13, kind: input, shape index: {}]   ;;  %s3935_s14 = inlined_call_operand.vmem [shape: f32[256,32], index: 14, kind: output, shape index: {0}]   ;;  %s3936_s15 = inlined_call_operand.hbm [shape: f32[256,128], index: 15, kind: output, shape index: {1}]   ;;  %s3937_s16 = inlined_call_operand.vmem [shape: f32[256,1], index: 16, kind: output, shape index: {2}]  }
   0x1   :  { %3942 = sst [smem:[#allocation9_spill]] %s3921_s0 }
   0x2   :  { %3943 = sst [smem:[#allocation10_spill]] %s3922_s1 }
   0x3   :  { %3944 = sst [smem:[#allocation11_spill]] %s3923_s2 }
   0x4   :  { %22 = vsyncpa [#allocation3], 0 }
   0x5   :  { %24 = vsyncpa [#allocation3 + $0x1], 0  ;;  %s3015_s21 = smov 0   ;;  %s3017_s22 = smov 0  }
   0x6   :  { %s3019_s23 = smov 0   ;;  %s3021_s24 = smov 0  }
   0x7 LB: > { %3945 = sst [smem:[#allocation5_spill]] %s2921_s23  ;;  %s3036_s25 = sadd.s32 4294967295, %s2925_s24   ;;  %s2925_s24 = sphi %s3021_s24, %s3955_s24   ;;  %s2921_s23 = sphi %s3019_s23, %s3957_s23   ;;  %s2917_s22 = sphi %s3017_s22, %s3959_s22   ;;  %s2913_s21 = sphi %s3015_s21, %s3958_s21  }
   0x8   : > { %s2183_s26 = sadd.s32 4294967294, %s2925_s24   ;;  %s3040_s27 = sadd.s32 1, %s2925_s24  }
   0x9   : > { %3946 = sst [smem:[#allocation6_spill]] %s3040_s27  ;;  %s362_s28 = sadd.s32 1, %s2921_s23 }
   0xa   : > { %s359_s29 = ssub.s32 %s2925_s24, %s3040_s27  ;;  %p372_p0 = scmp.ne.s32.totalorder %s2921_s23, %s2917_s22 }
   0xb   : > { %p360_p1 = scmp.eq.s32.totalorder %s359_s29, 0  ;;  %p373_p2 = scmp.eq.s32.totalorder %s3036_s25, 1 }
   0xc   : > { %p378_p3 = scmp.ne.s32.totalorder %s2917_s22, %s2913_s21  ;;  %p379_p4 = scmp.eq.s32.totalorder %s2183_s26, 1 }
   0xd   : > { %s3051_s30 = scalar_select %p360_p1, %s2921_s23, %s362_s28  }
   0xe   : > { %p3053_p5 = por %p373_p2, %p372_p0  ;;  %p3057_p6 = por %p379_p4, %p378_p3 }
   0xf   : > { %3947 = sst [smem:[#allocation7_spill]] %s3051_s30  ;;  %p2186_p7 = scmp.ge.s32.totalorder %s2925_s24, 1 }
  0x10   : > { %s3949_s17 = scalar_select %p3057_p6, 1, 0 }
  0x11   : > { %p471_p8 = scmp.lt.s32.totalorder %s2925_s24, 3 }
  0x12   : > { %3950 = sst [smem:[#allocation8_spill]] %s3949_s17 }
  0x13   : > { %p472_p9 = pnand %p2186_p7, %p471_p8 }
  0x14   : > { %s2188_s28 = sshll.u32 (!%p472_p9), %s3036_s25, 4  ;;  %s3951_s1 = sld [smem:[#allocation10_spill]] (!%p472_p9) }
  0x15   : > { %475 = sbr.rel (%p472_p9) target bundleno = 1181 (0x49d), region = 76  ;;  %p532_p10 = scmp.lt.s32.totalorder (!%p472_p9), %s2188_s28, 31 }
  0x16   : > { %s3952_s29 = sld [smem:[#allocation9_spill]] (!%p472_p9) }
  0x17   : > { %s3953_s2 = sld [smem:[#allocation11_spill]] (!%p472_p9) }
  0x1a   : > { %v878_v0 = vld [vmem:[%s3925_s4 + $0x18] sm:$0xff]  ;;  %v877_v1 = vld [vmem:[%s3925_s4 + $0x10] sm:$0xff]  ;;  %v876_v4 = vld [vmem:[%s3925_s4 + $0x8] sm:$0xff]  ;;  %s3961_s28 = smov (!%p532_p10, %s2188_s28), 31  ;;  %vm577_vm0 = vcmask 261120   ;;  %vm858_vm1 = vcmask 7168  }
  0x1b   : > { %2439 = vmatprep.subr.mxu1 %v878_v0  ;;  %v569_v2 = vld [vmem:[%s3951_s1 + $0x18] sm:$0xff]  ;;  %v568_v3 = vld [vmem:[%s3951_s1 + $0x10] sm:$0xff]  ;;  %v567_v5 = vld [vmem:[%s3951_s1 + $0x8] sm:$0xff]  ;;  %s3085_s23 = sshll.u32 %s3961_s28, 3 }
  0x1c   : > { %2440 = vmatpush3.msra.mxu1 %v878_v0  ;;  %2407 = vmatprep.subr.mxu0 %v569_v2  ;;  %v875_v6 = vld [vmem:[%s3925_s4] sm:$0xff]  ;;  %s3091_s18 = scalar_lea.vmem %s3952_s29, %s3085_s23  ;;  %v1062_v11 = vld [vmem:[%s3927_s6 + $0x78] sm:$0xff]  ;;  %v1061_v14 = vld [vmem:[%s3927_s6 + $0x70] sm:$0xff]  ;;  %s3688_s17 = scalar_lea.vmem %s3935_s14, %s3085_s23 }
  0x1d   : > { %2441 = vmatprep.subr.mxu1 %v877_v1  ;;  %2408 = vmatpush3.msra.mxu0 %v569_v2  ;;  %v566_v7 = vld [vmem:[%s3951_s1] sm:$0xff]  ;;  %v551_v9 = vld [vmem:[%s3091_s18 + $0x8] sm:$0xff]  ;;  %v552_v10 = vld [vmem:[%s3091_s18 + $0x10] sm:$0xff]  ;;  %s3706_s20 = scalar_lea.vmem %s3937_s16, %s3085_s23  ;;  %s521_s23 = sand.u32 1, %s2917_s22  }
  0x1e   : > { %2442 = vmatpush3.msra.mxu1 %v877_v1  ;;  %2409 = vmatprep.subr.mxu0 %v568_v3  ;;  %v550_v8 = vld [vmem:[%s3091_s18] sm:$0xff]  ;;  %v553_v12 = vld [vmem:[%s3091_s18 + $0x18] sm:$0xff]  ;;  %v555_v15 = vld [vmem:[%s3091_s18 + $0x28] sm:$0xff]  ;;  %s2187_s28 = sshll.u32 %s521_s23, 7 }
  0x1f   : > { %2443 = vmatprep.subr.mxu1 %v876_v4  ;;  %2410 = vmatpush3.msra.mxu0 %v568_v3  ;;  %v554_v13 = vld [vmem:[%s3091_s18 + $0x20] sm:$0xff]  ;;  %v556_v16 = vld [vmem:[%s3091_s18 + $0x30] sm:$0xff]  ;;  %v1060_v17 = vld [vmem:[%s3927_s6 + $0x68] sm:$0xff]  ;;  %s3817_s30 = scalar_lea.vmem [#allocation2], %s2187_s28  ;;  %s2927_s28 = smov [#allocation2]  }
  0x20   : > { %2444 = vmatpush3.msra.mxu1 %v876_v4  ;;  %2411 = vmatprep.subr.mxu0 %v567_v5  ;;  %v1059_v18 = vld [vmem:[%s3927_s6 + $0x60] sm:$0xff]  ;;  %v557_v19 = vld [vmem:[%s3091_s18 + $0x38] sm:$0xff]  ;;  %v1057_v22 = vld [vmem:[%s3927_s6 + $0x50] sm:$0xff]  ;;  %s2067_s26 = sshll.u32 %s3817_s30, 4  ;;  %s3866_s26 = int_to_ptr.vmem [resolvable:$true] %s2067_s26 }
  0x21   : > { %2445 = vmatprep.subr.mxu1 %v875_v6  ;;  %2412 = vmatpush3.msra.mxu0 %v567_v5  ;;  %v558_v20 = vld [vmem:[%s3091_s18 + $0x40] sm:$0xff]  ;;  %v1058_v21 = vld [vmem:[%s3927_s6 + $0x58] sm:$0xff]  ;;  %v559_v23 = vld [vmem:[%s3091_s18 + $0x48] sm:$0xff]  ;;  %s2865_s19 = scalar_lea.vmem %s3866_s26, 2048 }
  0x22   : > { %2446 = vmatpush3.msra.mxu1 %v875_v6  ;;  %2447 = vmatprep.mubr.msk.f32.mxu1 %vm577_vm0, %v550_v8  ;;  %v560_v24 = vld [vmem:[%s3091_s18 + $0x50] sm:$0xff]  ;;  %v1056_v25 = vld [vmem:[%s3927_s6 + $0x48] sm:$0xff]  ;;  %v1055_v26 = vld [vmem:[%s3927_s6 + $0x40] sm:$0xff]  ;;  %p2866_p11 = scmp.ne.s32.totalorder %s3866_s26, %s2865_s19 }
  0x23   : > { %2448 = vmatmul.mubr.msk.f32.vlgmr.msra.gmra.mxu1 %vm577_vm0, %v551_v9  ;;  %2413 = vmatprep.subr.mxu0 %v566_v7  ;;  %v561_v27 = vld [vmem:[%s3091_s18 + $0x58] sm:$0xff]  ;;  %v562_v28 = vld [vmem:[%s3091_s18 + $0x60] sm:$0xff]  ;;  %v1053_v30 = vld [vmem:[%s3927_s6 + $0x30] sm:$0xff] }
  0x24   : > { %2450 = vmatprep.mubr.msk.f32.mxu1 %vm577_vm0, %v552_v10  ;;  %2414 = vmatpush3.msra.mxu0 %v566_v7  ;;  %v1054_v29 = vld [vmem:[%s3927_s6 + $0x38] sm:$0xff]  ;;  %v563_v31 = vld [vmem:[%s3091_s18 + $0x68] sm:$0xff]  ;;  %v564_v32 = vld [vmem:[%s3091_s18 + $0x70] sm:$0xff]  ;;  %p2867_p12 = pnand %p2866_p11, %p3053_p5 }
  0x25   : > { %2415 = vmatprep.mubr.msk.f32.mxu0 %vm577_vm0, %v550_v8  ;;  %2471 = vmatprep.subr.mxu0 %v1062_v11  ;;  %v1052_v33 = vld [vmem:[%s3927_s6 + $0x28] sm:$0xff]  ;;  %v1051_v34 = vld [vmem:[%s3927_s6 + $0x20] sm:$0xff]  ;;  %v565_v35 = vld [vmem:[%s3091_s18 + $0x78] sm:$0xff]  ;;  %s2238_s18 = sshll.u32 %s3036_s25, 11  ;;  %s3877_s25 = scalar_lea.sflag [#allocation3], %s521_s23 }
  0x26   : > { %2416 = vmatmul.mubr.msk.f32.vlgmr.msra.gmra.mxu0 %vm577_vm0, %v551_v9  ;;  %v1050_v36 = vld [vmem:[%s3927_s6 + $0x18] sm:$0xff]  ;;  %v1049_v37 = vld [vmem:[%s3927_s6 + $0x10] sm:$0xff]  ;;  %v1048_v38 = vld [vmem:[%s3927_s6 + $0x8] sm:$0xff]  ;;  %s3864_s29 = scalar_lea.hbm %s3936_s15, %s2238_s18  ;;  %p2868_p13 = pneg %p2867_p12 }
  0x27   : > { %2451 = vmatmul.mubr.msk.f32.gmra.mxu1 %vm577_vm0, %v553_v12  ;;  %2472 = vmatpush3.msra.mxu0 %v1062_v11  ;;  %v1047_v39 = vld [vmem:[%s3927_s6] sm:$0xff]  ;;  %s2869_s18 = sshll.u32 %s2927_s28, 4  ;;  %s2870_s18 = int_to_ptr.vmem [resolvable:$false] %s2869_s18 }
  0x28   : > { %2453 = vmatprep.mubr.msk.f32.mxu1 %vm577_vm0, %v554_v13  ;;  %2418 = vmatprep.mubr.msk.f32.mxu0 %vm577_vm0, %v552_v10  ;;  %v3195_v40 = vld [vmem:[%s3926_s5] ss:$0 sm:$0xff]  ;;  %s2871_s27 = scalar_lea.vmem %s2870_s18, 4096  ;;  %p2872_p0 = scmp.lt.s32.totalorder %s3866_s26, %s2870_s18 }
  0x29   : > { %2473 = vmatprep.subr.mxu0 %v1061_v14  ;;  %v3220_v5 = vld [vmem:[%s3953_s2] ss:$0 sm:$0xff]  ;;  %p2873_p1 = scmp.lt.s32.totalorder %s2871_s27, %s2865_s19 }
  0x2a   : > { %2419 = vmatmul.mubr.msk.f32.gmra.mxu0 %vm577_vm0, %v553_v12 }
  0x2b   : > { %2454 = vmatmul.mubr.msk.f32.gmra.mxu1 %vm577_vm0, %v555_v15  ;;  %2474 = vmatpush3.msra.mxu0 %v1061_v14  ;;  %p2874_p2 = por %p2873_p1, %p2872_p0 }
  0x2c   : > { %2456 = vmatprep.mubr.msk.f32.mxu1 %vm577_vm0, %v556_v16  ;;  %2475 = vmatprep.subr.mxu0 %v1060_v17 }
  0x2d   : > { %2476 = vmatpush3.msra.mxu0 %v1060_v17  ;;  %2421 = vmatprep.mubr.msk.f32.mxu0 %vm577_vm0, %v554_v13  ;;  %p2875_p3 = pnand %p2874_p2, %p2868_p13 }
  0x2e   : > { %2477 = vmatprep.subr.mxu0 %v1059_v18  ;;  %2422 = vmatmul.mubr.msk.f32.gmra.mxu0 %vm577_vm0, %v555_v15 }
  0x2f   : > { %2457 = vmatmul.mubr.msk.f32.gmra.mxu1 %vm577_vm0, %v557_v19  ;;  %2478 = vmatpush3.msra.mxu0 %v1059_v18 }
  0x30   : > { %2459 = vmatprep.mubr.msk.f32.mxu1 %vm577_vm0, %v558_v20  ;;  %2479 = vmatprep.subr.mxu0 %v1058_v21 }
  0x31   : > { %2480 = vmatpush3.msra.mxu0 %v1058_v21  ;;  %2424 = vmatprep.mubr.msk.f32.mxu0 %vm577_vm0, %v556_v16 }
  0x32   : > { %2481 = vmatprep.subr.mxu0 %v1057_v22  ;;  %2425 = vmatmul.mubr.msk.f32.gmra.mxu0 %vm577_vm0, %v557_v19 }
  0x33   : > { %2460 = vmatmul.mubr.msk.f32.gmra.mxu1 %vm577_vm0, %v559_v23  ;;  %2482 = vmatpush3.msra.mxu0 %v1057_v22 }
  0x34   : > { %2462 = vmatprep.mubr.msk.f32.mxu1 %vm577_vm0, %v560_v24  ;;  %2483 = vmatprep.subr.mxu0 %v1056_v25 }
  0x35   : > { %2484 = vmatpush3.msra.mxu0 %v1056_v25  ;;  %2427 = vmatprep.mubr.msk.f32.mxu0 %vm577_vm0, %v558_v20 }
  0x36   : > { %2485 = vmatprep.subr.mxu0 %v1055_v26  ;;  %2428 = vmatmul.mubr.msk.f32.gmra.mxu0 %vm577_vm0, %v559_v23 }
  0x37   : > { %2463 = vmatmul.mubr.msk.f32.gmra.mxu1 %vm577_vm0, %v561_v27  ;;  %2486 = vmatpush3.msra.mxu0 %v1055_v26 }
  0x38   : > { %2465 = vmatprep.mubr.msk.f32.mxu1 %vm577_vm0, %v562_v28  ;;  %2487 = vmatprep.subr.mxu0 %v1054_v29 }
  0x39   : > { %2488 = vmatpush3.msra.mxu0 %v1054_v29  ;;  %2430 = vmatprep.mubr.msk.f32.mxu0 %vm577_vm0, %v560_v24 }
  0x3a   : > { %2489 = vmatprep.subr.mxu0 %v1053_v30  ;;  %2431 = vmatmul.mubr.msk.f32.gmra.mxu0 %vm577_vm0, %v561_v27 }
  0x3b   : > { %2466 = vmatmul.mubr.msk.f32.gmra.mxu1 %vm577_vm0, %v563_v31  ;;  %2490 = vmatpush3.msra.mxu0 %v1053_v30 }
  0x3c   : > { %2468 = vmatprep.mubr.msk.f32.mxu1 %vm577_vm0, %v564_v32  ;;  %2491 = vmatprep.subr.mxu0 %v1052_v33 }
  0x3d   : > { %2492 = vmatpush3.msra.mxu0 %v1052_v33  ;;  %2433 = vmatprep.mubr.msk.f32.mxu0 %vm577_vm0, %v562_v28 }
  0x3e   : > { %2493 = vmatprep.subr.mxu0 %v1051_v34  ;;  %2434 = vmatmul.mubr.msk.f32.gmra.mxu0 %vm577_vm0, %v563_v31 }
  0x3f   : > { %2469 = vmatmul.mubr.msk.f32.gmra.mxu1 %vm577_vm0, %v565_v35  ;;  %2494 = vmatpush3.msra.mxu0 %v1051_v34 }
  0x40   : > { %2495 = vmatprep.subr.mxu0 %v1050_v36  ;;  %2436 = vmatprep.mubr.msk.f32.mxu0 %vm577_vm0, %v564_v32 }
  0x41   : > { %2496 = vmatpush3.msra.mxu0 %v1050_v36 }
  0x42   : > { %2437 = vmatmul.mubr.msk.f32.gmra.mxu0 %vm577_vm0, %v565_v35  ;;  %2497 = vmatprep.subr.mxu0 %v1049_v37 }
  0x43   : > { %2498 = vmatpush3.msra.mxu0 %v1049_v37 }
  0x44   : > { %2499 = vmatprep.subr.mxu0 %v1048_v38 }
  0x45   : > { %2500 = vmatpush3.msra.mxu0 %v1048_v38 }
  0x46   : > { %2501 = vmatprep.subr.mxu0 %v1047_v39 }
  0x47   : > { %2502 = vmatpush3.msra.mxu0 %v1047_v39 }
  0xe3   : > { %v2449_v41 = vpop.f32.mrf.mxu1 }
  0xe4   : > { %v958_v42 = vadd.f32 %v2449_v41, %v3195_v40 }
  0xe5   : > { %v952_v43 = vpop.f32.mrf.mxu1 }
  0xe6   : > { %v953_v44 = vadd.f32 %v3195_v40, %v952_v43  ;;  %v3199_v45 = vpop.f32.mrf.mxu0  ;;  %v1032_v49 = vmax.f32 %v958_v42, 0.0 }
  0xe7   : > { %v2452_v46 = vpop.f32.mrf.mxu1 }
  0xe8   : > { %v1031_v47 = vmax.f32 %v953_v44, 0.0  ;;  %v3201_v48 = vpop.f32.mrf.mxu0  ;;  %v968_v50 = vadd.f32 %v2452_v46, %v3195_v40 }
  0xe9   : > { %v962_v51 = vpop.f32.mrf.mxu1 }
  0xea   : > { %v963_v52 = vadd.f32 %v3195_v40, %v962_v51  ;;  %2503 = vmatprep.mubr.f32.mxu0 %v1031_v47  ;;  %v3205_v53 = vpop.f32.mrf.mxu0  ;;  %v1034_v58 = vmax.f32 %v968_v50, 0.0 }
  0xeb   : > { %v2455_v54 = vpop.f32.mrf.mxu1  ;;  %2504 = vmatmul.mubr.f32.vlgmr.msra.gmra.mxu0 %v1032_v49 }
  0xec   : > { %v1033_v55 = vmax.f32 %v963_v52, 0.0  ;;  %v978_v56 = vadd.f32 %v2455_v54, %v3195_v40  ;;  %v3208_v57 = vpop.f32.mrf.mxu0 }
  0xed   : > { %v972_v59 = vpop.f32.mrf.mxu1 }
  0xee   : > { %v973_v60 = vadd.f32 %v3195_v40, %v972_v59  ;;  %2506 = vmatprep.mubr.f32.mxu0 %v1033_v55  ;;  %v3211_v61 = vpop.f32.mrf.mxu0  ;;  %v1036_v62 = vmax.f32 %v978_v56, 0.0 }
  0xef   : > { %v2458_v63 = vpop.f32.mrf.mxu1  ;;  %2507 = vmatmul.mubr.f32.gmra.mxu0 %v1034_v58  ;;  %v3243_v58 = vld [vmem:[%s3924_s3] ss:$0 sm:$0xff] }
  0xf0   : > { %v1035_v0 = vmax.f32 %v973_v60, 0.0  ;;  %v988_v1 = vadd.f32 %v2458_v63, %v3195_v40  ;;  %v3214_v2 = vpop.f32.mrf.mxu0 }
  0xf1   : > { %v982_v3 = vpop.f32.mrf.mxu1 }
  0xf2   : > { %v983_v4 = vadd.f32 %v3195_v40, %v982_v3  ;;  %2509 = vmatprep.mubr.f32.mxu0 %v1035_v0  ;;  %v2426_v6 = vpop.f32.mrf.mxu0  ;;  %v1038_v7 = vmax.f32 %v988_v1, 0.0 }
  0xf3   : > { %v2461_v8 = vpop.f32.mrf.mxu1  ;;  %2510 = vmatmul.mubr.f32.gmra.mxu0 %v1036_v62  ;;  %v728_v9 = vadd.f32 %v2426_v6, %v3220_v5 }
  0xf4   : > { %v1037_v10 = vmax.f32 %v983_v4, 0.0  ;;  %v998_v11 = vadd.f32 %v2461_v8, %v3195_v40  ;;  %v722_v12 = vpop.f32.mrf.mxu0 }
  0xf5   : > { %v992_v13 = vpop.f32.mrf.mxu1  ;;  %v723_v14 = vadd.f32 %v3220_v5, %v722_v12  ;;  %2736 = vtanh.f32 %v728_v9 }
  0xf6   : > { %v993_v15 = vadd.f32 %v3195_v40, %v992_v13  ;;  %2512 = vmatprep.mubr.f32.mxu0 %v1037_v10  ;;  %v2429_v16 = vpop.f32.mrf.mxu0  ;;  %v1040_v17 = vmax.f32 %v998_v11, 0.0 }
  0xf7   : > { %v2464_v18 = vpop.f32.mrf.mxu1  ;;  %2513 = vmatmul.mubr.f32.gmra.mxu0 %v1038_v7  ;;  %v738_v19 = vadd.f32 %v2429_v16, %v3220_v5  ;;  %2738 = vtanh.f32 %v723_v14  ;;  %v1326_v16 = vld [vmem:[%s3929_s8 + $0x78] sm:$0xff] }
  0xf8   : > { %v1039_v20 = vmax.f32 %v993_v15, 0.0  ;;  %v1008_v21 = vadd.f32 %v2464_v18, %v3195_v40  ;;  %v732_v22 = vpop.f32.mrf.mxu0  ;;  %2527 = vmatprep.subr.mxu1 %v1326_v16  ;;  %v1324_v18 = vld [vmem:[%s3929_s8 + $0x68] sm:$0xff] }
  0xf9   : > { %v1002_v23 = vpop.f32.mrf.mxu1  ;;  %v733_v24 = vadd.f32 %v3220_v5, %v732_v22  ;;  %2740 = vtanh.f32 %v738_v19  ;;  %2528 = vmatpush3.msra.mxu1 %v1326_v16  ;;  %v1323_v19 = vld [vmem:[%s3929_s8 + $0x60] sm:$0xff]  ;;  %v1317_v16 = vld [vmem:[%s3929_s8 + $0x30] sm:$0xff] }
  0xfa   : > { %v1003_v25 = vadd.f32 %v3195_v40, %v1002_v23  ;;  %2515 = vmatprep.mubr.f32.mxu0 %v1039_v20  ;;  %v2432_v26 = vpop.f32.mrf.mxu0  ;;  %v1042_v27 = vmax.f32 %v1008_v21, 0.0  ;;  %v1322_v20 = vld [vmem:[%s3929_s8 + $0x58] sm:$0xff]  ;;  %v1321_v21 = vld [vmem:[%s3929_s8 + $0x50] sm:$0xff]  ;;  %v3296_v23 = vld [vmem:[%s3928_s7] ss:$0 sm:$0xff] }
  0xfb   : > { %v2467_v28 = vpop.f32.mrf.mxu1  ;;  %2516 = vmatmul.mubr.f32.gmra.mxu0 %v1040_v17  ;;  %v748_v29 = vadd.f32 %v2432_v26, %v3220_v5  ;;  %2742 = vtanh.f32 %v733_v24  ;;  %v1325_v17 = vld [vmem:[%s3929_s8 + $0x70] sm:$0xff] }
  0xfc   : > { %v1041_v30 = vmax.f32 %v1003_v25, 0.0  ;;  %v1018_v31 = vadd.f32 %v2467_v28, %v3195_v40  ;;  %v742_v32 = vpop.f32.mrf.mxu0  ;;  %2529 = vmatprep.subr.mxu1 %v1325_v17 }
  0xfd   : > { %v1012_v33 = vpop.f32.mrf.mxu1  ;;  %v743_v34 = vadd.f32 %v3220_v5, %v742_v32  ;;  %2744 = vtanh.f32 %v748_v29  ;;  %2530 = vmatpush3.msra.mxu1 %v1325_v17 }
  0xfe   : > { %v1013_v35 = vadd.f32 %v3195_v40, %v1012_v33  ;;  %2518 = vmatprep.mubr.f32.mxu0 %v1041_v30  ;;  %v2435_v36 = vpop.f32.mrf.mxu0  ;;  %v1044_v37 = vmax.f32 %v1018_v31, 0.0  ;;  %2531 = vmatprep.subr.mxu1 %v1324_v18 }
  0xff   : > { %v2470_v38 = vpop.f32.mrf.mxu1  ;;  %2519 = vmatmul.mubr.f32.gmra.mxu0 %v1042_v27  ;;  %v758_v39 = vadd.f32 %v2435_v36, %v3220_v5  ;;  %2746 = vtanh.f32 %v743_v34  ;;  %2532 = vmatpush3.msra.mxu1 %v1324_v18 }
 0x100   : > { %v1043_v41 = vmax.f32 %v1013_v35, 0.0  ;;  %v1028_v42 = vadd.f32 %v2470_v38, %v3195_v40  ;;  %v752_v43 = vpop.f32.mrf.mxu0  ;;  %2533 = vmatprep.subr.mxu1 %v1323_v19 }
 0x101   : > { %v1022_v44 = vpop.f32.mrf.mxu1  ;;  %v753_v46 = vadd.f32 %v3220_v5, %v752_v43  ;;  %2748 = vtanh.f32 %v758_v39  ;;  %2534 = vmatpush3.msra.mxu1 %v1323_v19  ;;  %v1316_v19 = vld [vmem:[%s3929_s8 + $0x28] sm:$0xff] }
 0x102   : > { %v1023_v47 = vadd.f32 %v3195_v40, %v1022_v44  ;;  %2521 = vmatprep.mubr.f32.mxu0 %v1043_v41  ;;  %v2438_v49 = vpop.f32.mrf.mxu0  ;;  %v1046_v50 = vmax.f32 %v1028_v42, 0.0  ;;  %v2737_v55 = vpop.eup %2736  ;;  %2535 = vmatprep.subr.mxu1 %v1322_v20 }
 0x103   : > { %2522 = vmatmul.mubr.f32.gmra.mxu0 %v1044_v37  ;;  %v768_v51 = vadd.f32 %v2438_v49, %v3220_v5  ;;  %2750 = vtanh.f32 %v753_v46  ;;  %v3246_v60 = vmul.f32 %v2737_v55, %v3243_v58  ;;  %2536 = vmatpush3.msra.mxu1 %v1322_v20 }
 0x104   : > { %v1045_v52 = vmax.f32 %v1023_v47, 0.0  ;;  %v762_v54 = vpop.f32.mrf.mxu0  ;;  %v2739_v56 = vpop.eup %2738  ;;  %2537 = vmatprep.subr.mxu1 %v1321_v21 }
 0x105   : > { %v763_v40 = vadd.f32 %v3220_v5, %v762_v54  ;;  %2752 = vtanh.f32 %v768_v51  ;;  %v3249_v62 = vmul.f32 %v2739_v56, %v3243_v58  ;;  %2538 = vmatpush3.msra.mxu1 %v1321_v21  ;;  %v1320_v51 = vld [vmem:[%s3929_s8 + $0x48] sm:$0xff]  ;;  %v1319_v54 = vld [vmem:[%s3929_s8 + $0x40] sm:$0xff] }
 0x106   : > { %2524 = vmatprep.mubr.f32.mxu0 %v1045_v52  ;;  %v2741_v59 = vpop.eup %2740  ;;  %2539 = vmatprep.subr.mxu1 %v1320_v51 }
 0x107   : > { %2525 = vmatmul.mubr.f32.gmra.mxu0 %v1046_v50  ;;  %2754 = vtanh.f32 %v763_v40  ;;  %v3252_v1 = vmul.f32 %v2741_v59, %v3243_v58  ;;  %2540 = vmatpush3.msra.mxu1 %v1320_v51  ;;  %v1506_v51 = vld [vmem:[%s3931_s10 + $0x58] sm:$0xff] }
 0x108   : > { %v2743_v63 = vpop.eup %2742  ;;  %2541 = vmatprep.subr.mxu1 %v1319_v54 }
 0x109   : > { %v3255_v3 = vmul.f32 %v2743_v63, %v3243_v58  ;;  %2542 = vmatpush3.msra.mxu1 %v1319_v54  ;;  %v1505_v54 = vld [vmem:[%s3931_s10 + $0x50] sm:$0xff] }
 0x10a   : > { %v2745_v0 = vpop.eup %2744 }
 0x10b   : > { %v3258_v7 = vmul.f32 %v2745_v0, %v3243_v58 }
 0x10c   : > { %v2747_v4 = vpop.eup %2746 }
 0x10d   : > { %v3261_v8 = vmul.f32 %v2747_v4, %v3243_v58  ;;  %v1318_v4 = vld [vmem:[%s3929_s8 + $0x38] sm:$0xff] }
 0x10e   : > { %v2749_v6 = vpop.eup %2748  ;;  %2543 = vmatprep.subr.mxu1 %v1318_v4 }
 0x10f   : > { %v3264_v11 = vmul.f32 %v2749_v6, %v3243_v58  ;;  %2544 = vmatpush3.msra.mxu1 %v1318_v4  ;;  %v1500_v4 = vld [vmem:[%s3931_s10 + $0x28] sm:$0xff] }
 0x110   : > { %v2751_v9 = vpop.eup %2750  ;;  %2545 = vmatprep.subr.mxu1 %v1317_v16 }
 0x111   : > { %v3267_v12 = vmul.f32 %v2751_v9, %v3243_v58  ;;  %2546 = vmatpush3.msra.mxu1 %v1317_v16 }
 0x112   : > { %v2753_v10 = vpop.eup %2752  ;;  %2547 = vmatprep.subr.mxu1 %v1316_v19 }
 0x113   : > { %v3270_v14 = vmul.f32 %v2753_v10, %v3243_v58  ;;  %2548 = vmatpush3.msra.mxu1 %v1316_v19 }
 0x114   : > { %v2755_v13 = vpop.eup %2754 }
 0x115   : > { %v3273_v15 = vmul.f32 %v2755_v13, %v3243_v58 }
 0x1ab   : > { %v2505_v22 = vpop.f32.mrf.mxu0 }
 0x1ac   : > { %v3302_v27 = vadd.f32 %v2505_v22, %v3296_v23 }
 0x1ad   : > { %v1136_v24 = vpop.f32.mrf.mxu0 }
 0x1ae   : > { %v3299_v25 = vadd.f32 %v3296_v23, %v1136_v24  ;;  %v1216_v34 = vmul.f32 %v3302_v27, %v3302_v27 }
 0x1af   : > { %v2508_v26 = vpop.f32.mrf.mxu0 }
 0x1b0   : > { %v1215_v28 = vmul.f32 %v3299_v25, %v3299_v25  ;;  %v3310_v32 = vadd.f32 %v2508_v26, %v3296_v23 }
 0x1b1   : > { %v1146_v29 = vpop.f32.mrf.mxu0 }
 0x1b2   : > { %v3307_v30 = vadd.f32 %v3296_v23, %v1146_v29  ;;  %1231 = vadd.xlane.f32.xlu0 %v1215_v28  ;;  %v1218_v39 = vmul.f32 %v3310_v32, %v3310_v32  ;;  %v1315_v28 = vld [vmem:[%s3929_s8 + $0x20] sm:$0xff] }
 0x1b3   : > { %v2511_v31 = vpop.f32.mrf.mxu0  ;;  %2549 = vmatprep.subr.mxu1 %v1315_v28 }
 0x1b4   : > { %v1217_v33 = vmul.f32 %v3307_v30, %v3307_v30  ;;  %v3320_v38 = vadd.f32 %v2511_v31, %v3296_v23  ;;  %2550 = vmatpush3.msra.mxu1 %v1315_v28 }
 0x1b5   : > { %v1156_v35 = vpop.f32.mrf.mxu0 }
 0x1b6   : > { %v3317_v36 = vadd.f32 %v3296_v23, %v1156_v35  ;;  %1235 = vadd.xlane.f32.xlu1 %v1217_v33  ;;  %1233 = vadd.xlane.f32.xlu0 %v1216_v34  ;;  %v1220_v47 = vmul.f32 %v3320_v38, %v3320_v38  ;;  %v1314_v35 = vld [vmem:[%s3929_s8 + $0x18] sm:$0xff] }
 0x1b7   : > { %v2514_v37 = vpop.f32.mrf.mxu0  ;;  %2551 = vmatprep.subr.mxu1 %v1314_v35 }
 0x1b8   : > { %v1219_v41 = vmul.f32 %v3317_v36, %v3317_v36  ;;  %v3330_v46 = vadd.f32 %v2514_v37, %v3296_v23  ;;  %v1313_v37 = vld [vmem:[%s3929_s8 + $0x10] sm:$0xff]  ;;  %2552 = vmatpush3.msra.mxu1 %v1314_v35 }
 0x1b9   : > { %v1166_v42 = vpop.f32.mrf.mxu0  ;;  %2553 = vmatprep.subr.mxu1 %v1313_v37 }
 0x1ba   : > { %v3327_v43 = vadd.f32 %v3296_v23, %v1166_v42  ;;  %1237 = vadd.xlane.f32.xlu1 %v1218_v39  ;;  %1239 = vadd.xlane.f32.xlu0 %v1219_v41  ;;  %v1222_v56 = vmul.f32 %v3330_v46, %v3330_v46  ;;  %v1312_v39 = vld [vmem:[%s3929_s8 + $0x8] sm:$0xff]  ;;  %v1311_v41 = vld [vmem:[%s3929_s8] sm:$0xff]  ;;  %v3411_v42 = vld [vmem:[%s3933_s12 + $0x78] sm:$0xff] }
 0x1bb   : > { %v2517_v44 = vpop.f32.mrf.mxu0  ;;  %2554 = vmatpush3.msra.mxu1 %v1313_v37 }
 0x1bc   : > { %v1221_v49 = vmul.f32 %v3327_v43, %v3327_v43  ;;  %v3346_v40 = vadd.f32 %v2517_v44, %v3296_v23  ;;  %2555 = vmatprep.subr.mxu1 %v1312_v39  ;;  %v1510_v44 = vld [vmem:[%s3931_s10 + $0x78] sm:$0xff] }
 0x1bd   : > { %v1176_v50 = vpop.f32.mrf.mxu0  ;;  %2556 = vmatpush3.msra.mxu1 %v1312_v39  ;;  %2583 = vmatprep.subr.mxu0 %v1510_v44 }
 0x1be   : > { %v3340_v52 = vadd.f32 %v3296_v23, %v1176_v50  ;;  %1241 = vadd.xlane.f32.xlu1 %v1220_v47  ;;  %1243 = vadd.xlane.f32.xlu0 %v1221_v49  ;;  %v1224_v10 = vmul.f32 %v3346_v40, %v3346_v40  ;;  %v1509_v47 = vld [vmem:[%s3931_s10 + $0x70] sm:$0xff]  ;;  %v1508_v49 = vld [vmem:[%s3931_s10 + $0x68] sm:$0xff]  ;;  %v1507_v50 = vld [vmem:[%s3931_s10 + $0x60] sm:$0xff] }
 0x1bf   : > { %v2520_v55 = vpop.f32.mrf.mxu0  ;;  %2557 = vmatprep.subr.mxu1 %v1311_v41  ;;  %2584 = vmatpush3.msra.mxu0 %v1510_v44 }
 0x1c0   : > { %v1223_v59 = vmul.f32 %v3340_v52, %v3340_v52  ;;  %v3359_v9 = vadd.f32 %v2520_v55, %v3296_v23  ;;  %2558 = vmatpush3.msra.mxu1 %v1311_v41  ;;  %2585 = vmatprep.subr.mxu0 %v1509_v47  ;;  %v1504_v55 = vld [vmem:[%s3931_s10 + $0x48] sm:$0xff] }
 0x1c1   : > { %v1186_v63 = vpop.f32.mrf.mxu0  ;;  %2639 = vmatprep.subr.mxu1 %v3411_v42  ;;  %2586 = vmatpush3.msra.mxu0 %v1509_v47 }
 0x1c2   : > { %v3353_v0 = vadd.f32 %v3296_v23, %v1186_v63  ;;  %1245 = vadd.xlane.f32.xlu1 %v1222_v56  ;;  %1247 = vadd.xlane.f32.xlu0 %v1223_v59  ;;  %v1226_v22 = vmul.f32 %v3359_v9, %v3359_v9  ;;  %v1503_v56 = vld [vmem:[%s3931_s10 + $0x40] sm:$0xff]  ;;  %v1502_v59 = vld [vmem:[%s3931_s10 + $0x38] sm:$0xff]  ;;  %v1501_v63 = vld [vmem:[%s3931_s10 + $0x30] sm:$0xff] }
 0x1c3   : > { %v2523_v6 = vpop.f32.mrf.mxu0  ;;  %2587 = vmatprep.subr.mxu0 %v1508_v49 }
 0x1c4   : > { %v1225_v13 = vmul.f32 %v3353_v0, %v3353_v0  ;;  %v3375_v21 = vadd.f32 %v2523_v6, %v3296_v23  ;;  %2588 = vmatpush3.msra.mxu0 %v1508_v49  ;;  %v1499_v6 = vld [vmem:[%s3931_s10 + $0x20] sm:$0xff] }
 0x1c5   : > { %v1196_v17 = vpop.f32.mrf.mxu0  ;;  %2589 = vmatprep.subr.mxu0 %v1507_v50 }
 0x1c6   : > { %v3369_v18 = vadd.f32 %v3296_v23, %v1196_v17  ;;  %1249 = vadd.xlane.f32.xlu1 %v1224_v10  ;;  %1251 = vadd.xlane.f32.xlu0 %v1225_v13  ;;  %v1228_v33 = vmul.f32 %v3375_v21, %v3375_v21 }
 0x1c7   : > { %v2526_v20 = vpop.f32.mrf.mxu0  ;;  %2590 = vmatpush3.msra.mxu0 %v1507_v50 }
 0x1c8   : > { %v1227_v24 = vmul.f32 %v3369_v18, %v3369_v18  ;;  %v3388_v31 = vadd.f32 %v2526_v20, %v3296_v23  ;;  %2591 = vmatprep.subr.mxu0 %v1506_v51 }
 0x1c9   : > { %v1206_v26 = vpop.f32.mrf.mxu0  ;;  %2592 = vmatpush3.msra.mxu0 %v1506_v51 }
 0x1ca   : > { %v3385_v29 = vadd.f32 %v3296_v23, %v1206_v26  ;;  %1253 = vadd.xlane.f32.xlu1 %v1226_v22  ;;  %1255 = vadd.xlane.f32.xlu0 %v1227_v24  ;;  %v1230_v23 = vmul.f32 %v3388_v31, %v3388_v31 }
 0x1cb   : > { %2593 = vmatprep.subr.mxu0 %v1505_v54 }
 0x1cc   : > { %v1229_v34 = vmul.f32 %v3385_v29, %v3385_v29  ;;  %2594 = vmatpush3.msra.mxu0 %v1505_v54 }
 0x1cd   : > { %2595 = vmatprep.subr.mxu0 %v1504_v55 }
 0x1ce   : > { %1257 = vadd.xlane.f32.xlu1 %v1228_v33  ;;  %1259 = vadd.xlane.f32.xlu0 %v1229_v34 }
 0x1cf   : > { %2596 = vmatpush3.msra.mxu0 %v1504_v55 }
 0x1d0   : > { %2597 = vmatprep.subr.mxu0 %v1503_v56 }
 0x1d1   : > { %2598 = vmatpush3.msra.mxu0 %v1503_v56 }
 0x1d2   : > { %1261 = vadd.xlane.f32.xlu1 %v1230_v23  ;;  %2599 = vmatprep.subr.mxu0 %v1502_v59 }
 0x1d3   : > { %2600 = vmatpush3.msra.mxu0 %v1502_v59 }
 0x1d4   : > { %2601 = vmatprep.subr.mxu0 %v1501_v63 }
 0x1d5   : > { %2602 = vmatpush3.msra.mxu0 %v1501_v63 }
 0x1d6   : > { %2603 = vmatprep.subr.mxu0 %v1500_v4 }
 0x1d7   : > { %2604 = vmatpush3.msra.mxu0 %v1500_v4 }
 0x1d8   : > { %2605 = vmatprep.subr.mxu0 %v1499_v6 }
 0x1d9   : > { %2606 = vmatpush3.msra.mxu0 %v1499_v6 }
 0x23b   : > { %v1232_v10 = vpop.xlane.xlu0 %1231 }
 0x23c   : > { %v1263_v13 = vmax.f32 %v1232_v10, 1e-24 }
 0x23e   : > { %2756 = vrsqrt.f32 %v1263_v13 }
 0x23f   : > { %v1236_v16 = vpop.xlane.xlu1 %1235  ;;  %v1234_v17 = vpop.xlane.xlu0 %1233 }
 0x240   : > { %v1265_v19 = vmax.f32 %v1236_v16, 1e-24  ;;  %v1264_v20 = vmax.f32 %v1234_v17, 1e-24 }
 0x242   : > { %2758 = vrsqrt.f32 %v1265_v19 }
 0x243   : > { %2760 = vrsqrt.f32 %v1264_v20  ;;  %v1238_v22 = vpop.xlane.xlu1 %1237  ;;  %v1240_v24 = vpop.xlane.xlu0 %1239 }
 0x244   : > { %v1266_v26 = vmax.f32 %v1238_v22, 1e-24  ;;  %v1267_v28 = vmax.f32 %v1240_v24, 1e-24 }
 0x246   : > { %2762 = vrsqrt.f32 %v1266_v26 }
 0x247   : > { %2764 = vrsqrt.f32 %v1267_v28  ;;  %v1242_v33 = vpop.xlane.xlu1 %1241  ;;  %v1244_v34 = vpop.xlane.xlu0 %1243 }
 0x248   : > { %v1268_v35 = vmax.f32 %v1242_v33, 1e-24  ;;  %v1269_v37 = vmax.f32 %v1244_v34, 1e-24  ;;  %v1690_v33 = vld [vmem:[%s3933_s12 + $0x58] sm:$0xff] }
 0x24a   : > { %2766 = vrsqrt.f32 %v1268_v35 }
 0x24b   : > { %v2757_v23 = vpop.eup %2756  ;;  %2768 = vrsqrt.f32 %v1269_v37  ;;  %v1246_v39 = vpop.xlane.xlu1 %1245  ;;  %v1689_v37 = vld [vmem:[%s3933_s12 + $0x50] sm:$0xff] }
 0x24c   : > { %v1248_v41 = vpop.xlane.xlu0 %1247  ;;  %v1270_v44 = vmax.f32 %v1246_v39, 1e-24  ;;  %v3451_v49 = vmul.f32 %v2757_v23, %v3299_v25  ;;  %v1693_v25 = vld [vmem:[%s3933_s12 + $0x70] sm:$0xff] }
 0x24d   : > { %v1271_v47 = vmax.f32 %v1248_v41, 1e-24 }
 0x24e   : > { %2770 = vrsqrt.f32 %v1270_v44  ;;  %2559 = vmatprep.mubr.f32.mxu1 %v3451_v49 }
 0x24f   : > { %v2759_v50 = vpop.eup %2758  ;;  %2772 = vrsqrt.f32 %v1271_v47  ;;  %v1250_v51 = vpop.xlane.xlu1 %1249 }
 0x250   : > { %v1252_v54 = vpop.xlane.xlu0 %1251  ;;  %v2761_v55 = vpop.eup %2760  ;;  %v1272_v56 = vmax.f32 %v1250_v51, 1e-24  ;;  %v3455_v63 = vmul.f32 %v2759_v50, %v3307_v30  ;;  %v1687_v50 = vld [vmem:[%s3933_s12 + $0x40] sm:$0xff] }
 0x251   : > { %v1273_v59 = vmax.f32 %v1252_v54, 1e-24  ;;  %v3458_v4 = vmul.f32 %v2761_v55, %v3302_v27  ;;  %v1692_v27 = vld [vmem:[%s3933_s12 + $0x68] sm:$0xff] }
 0x252   : > { %2774 = vrsqrt.f32 %v1272_v56  ;;  %v1685_v56 = vld [vmem:[%s3933_s12 + $0x30] sm:$0xff] }
 0x253   : > { %v2763_v6 = vpop.eup %2762  ;;  %2776 = vrsqrt.f32 %v1273_v59  ;;  %2560 = vmatmul.mubr.f32.vlgmr.msra.gmra.mxu1 %v3458_v4  ;;  %v1254_v10 = vpop.xlane.xlu1 %1253 }
 0x254   : > { %v1256_v13 = vpop.xlane.xlu0 %1255  ;;  %v2765_v16 = vpop.eup %2764  ;;  %2640 = vmatpush3.msra.mxu1 %v3411_v42  ;;  %v1274_v17 = vmax.f32 %v1254_v10, 1e-24  ;;  %2562 = vmatprep.mubr.f32.mxu1 %v3455_v63  ;;  %v3470_v19 = vmul.f32 %v2763_v6, %v3310_v32  ;;  %v1691_v42 = vld [vmem:[%s3933_s12 + $0x60] sm:$0xff]  ;;  %v1684_v6 = vld [vmem:[%s3933_s12 + $0x28] sm:$0xff] }
 0x255   : > { %v1275_v30 = vmax.f32 %v1256_v13, 1e-24  ;;  %2641 = vmatprep.subr.mxu1 %v1693_v25  ;;  %v3473_v20 = vmul.f32 %v2765_v16, %v3317_v36  ;;  %v1683_v10 = vld [vmem:[%s3933_s12 + $0x20] sm:$0xff] }
 0x256   : > { %2778 = vrsqrt.f32 %v1274_v17  ;;  %2642 = vmatpush3.msra.mxu1 %v1693_v25  ;;  %v1682_v17 = vld [vmem:[%s3933_s12 + $0x18] sm:$0xff] }
 0x257   : > { %v2767_v22 = vpop.eup %2766  ;;  %2780 = vrsqrt.f32 %v1275_v30  ;;  %2643 = vmatprep.subr.mxu1 %v1692_v27  ;;  %2563 = vmatmul.mubr.f32.gmra.mxu1 %v3470_v19  ;;  %v1258_v24 = vpop.xlane.xlu1 %1257  ;;  %v1681_v30 = vld [vmem:[%s3933_s12 + $0x10] sm:$0xff] }
 0x258   : > { %v1260_v26 = vpop.xlane.xlu0 %1259  ;;  %v2769_v28 = vpop.eup %2768  ;;  %2644 = vmatpush3.msra.mxu1 %v1692_v27  ;;  %v1276_v32 = vmax.f32 %v1258_v24, 1e-24  ;;  %2565 = vmatprep.mubr.f32.mxu1 %v3473_v20  ;;  %v3484_v34 = vmul.f32 %v2767_v22, %v3320_v38 }
 0x259   : > { %v1277_v36 = vmax.f32 %v1260_v26, 1e-24  ;;  %2645 = vmatprep.subr.mxu1 %v1691_v42  ;;  %v3487_v35 = vmul.f32 %v2769_v28, %v3327_v43  ;;  %v1688_v43 = vld [vmem:[%s3933_s12 + $0x48] sm:$0xff] }
 0x25a   : > { %2782 = vrsqrt.f32 %v1276_v32  ;;  %2646 = vmatpush3.msra.mxu1 %v1691_v42  ;;  %v1680_v42 = vld [vmem:[%s3933_s12 + $0x8] sm:$0xff] }
 0x25b   : > { %v2771_v23 = vpop.eup %2770  ;;  %2784 = vrsqrt.f32 %v1277_v36  ;;  %2647 = vmatprep.subr.mxu1 %v1690_v33  ;;  %2566 = vmatmul.mubr.f32.gmra.mxu1 %v3484_v34  ;;  %v1262_v39 = vpop.xlane.xlu1 %1261 }
 0x25c   : > { %v2773_v41 = vpop.eup %2772  ;;  %2648 = vmatpush3.msra.mxu1 %v1690_v33  ;;  %v1278_v38 = vmax.f32 %v1262_v39, 1e-24  ;;  %2568 = vmatprep.mubr.f32.mxu1 %v3487_v35  ;;  %v3498_v44 = vmul.f32 %v2771_v23, %v3330_v46  ;;  %v1686_v46 = vld [vmem:[%s3933_s12 + $0x38] sm:$0xff] }
 0x25d   : > { %2649 = vmatprep.subr.mxu1 %v1689_v37  ;;  %v1303_v47 = vmul.f32 %v2773_v41, %v3340_v52 }
 0x25e   : > { %2786 = vrsqrt.f32 %v1278_v38  ;;  %2650 = vmatpush3.msra.mxu1 %v1689_v37 }
 0x25f   : > { %v2775_v51 = vpop.eup %2774  ;;  %2651 = vmatprep.subr.mxu1 %v1688_v43  ;;  %2569 = vmatmul.mubr.f32.gmra.mxu1 %v3498_v44 }
 0x260   : > { %v2777_v54 = vpop.eup %2776  ;;  %2652 = vmatpush3.msra.mxu1 %v1688_v43  ;;  %2571 = vmatprep.mubr.f32.mxu1 %v1303_v47  ;;  %v1304_v55 = vmul.f32 %v2775_v51, %v3346_v40 }
 0x261   : > { %2653 = vmatprep.subr.mxu1 %v1687_v50  ;;  %v1305_v52 = vmul.f32 %v2777_v54, %v3353_v0 }
 0x262   : > { %2654 = vmatpush3.msra.mxu1 %v1687_v50 }
 0x263   : > { %v2779_v59 = vpop.eup %2778  ;;  %2655 = vmatprep.subr.mxu1 %v1686_v46  ;;  %2572 = vmatmul.mubr.f32.gmra.mxu1 %v1304_v55 }
 0x264   : > { %v2781_v25 = vpop.eup %2780  ;;  %2656 = vmatpush3.msra.mxu1 %v1686_v46  ;;  %2574 = vmatprep.mubr.f32.mxu1 %v1305_v52  ;;  %v1306_v40 = vmul.f32 %v2779_v59, %v3359_v9 }
 0x265   : > { %2657 = vmatprep.subr.mxu1 %v1685_v56  ;;  %v1307_v0 = vmul.f32 %v2781_v25, %v3369_v18 }
 0x266   : > { %2658 = vmatpush3.msra.mxu1 %v1685_v56 }
 0x267   : > { %v2783_v13 = vpop.eup %2782  ;;  %2659 = vmatprep.subr.mxu1 %v1684_v6  ;;  %2575 = vmatmul.mubr.f32.gmra.mxu1 %v1306_v40 }
 0x268   : > { %v2785_v16 = vpop.eup %2784  ;;  %2660 = vmatpush3.msra.mxu1 %v1684_v6  ;;  %2577 = vmatprep.mubr.f32.mxu1 %v1307_v0  ;;  %v1308_v9 = vmul.f32 %v2783_v13, %v3375_v21  ;;  %v1679_v21 = vld [vmem:[%s3933_s12] sm:$0xff] }
 0x269   : > { %2661 = vmatprep.subr.mxu1 %v1683_v10  ;;  %v1309_v18 = vmul.f32 %v2785_v16, %v3385_v29  ;;  %v1498_v29 = vld [vmem:[%s3931_s10 + $0x18] sm:$0xff] }
 0x26a   : > { %2662 = vmatpush3.msra.mxu1 %v1683_v10  ;;  %2607 = vmatprep.subr.mxu0 %v1498_v29 }
 0x26b   : > { %v2787_v27 = vpop.eup %2786  ;;  %2663 = vmatprep.subr.mxu1 %v1682_v17  ;;  %2578 = vmatmul.mubr.f32.gmra.mxu1 %v1308_v9 }
 0x26c   : > { %2664 = vmatpush3.msra.mxu1 %v1682_v17  ;;  %2580 = vmatprep.mubr.f32.mxu1 %v1309_v18  ;;  %v1310_v22 = vmul.f32 %v2787_v27, %v3388_v31  ;;  %v1497_v31 = vld [vmem:[%s3931_s10 + $0x10] sm:$0xff] }
 0x26d   : > { %2665 = vmatprep.subr.mxu1 %v1681_v30  ;;  %2608 = vmatpush3.msra.mxu0 %v1498_v29 }
 0x26e   : > { %2666 = vmatpush3.msra.mxu1 %v1681_v30  ;;  %2609 = vmatprep.subr.mxu0 %v1497_v31 }
 0x26f   : > { %2667 = vmatprep.subr.mxu1 %v1680_v42  ;;  %2581 = vmatmul.mubr.f32.gmra.mxu1 %v1310_v22 }
 0x270   : > { %2668 = vmatpush3.msra.mxu1 %v1680_v42  ;;  %2671 = vmatprep.mubr.f32.mxu1 %v3451_v49  ;;  %v1496_v49 = vld [vmem:[%s3931_s10 + $0x8] sm:$0xff] }
 0x271   : > { %2669 = vmatprep.subr.mxu1 %v1679_v21  ;;  %2610 = vmatpush3.msra.mxu0 %v1497_v31 }
 0x272   : > { %2670 = vmatpush3.msra.mxu1 %v1679_v21  ;;  %2611 = vmatprep.subr.mxu0 %v1496_v49 }
 0x273   : > { %2672 = vmatmul.mubr.f32.vlgmr.msra.gmra.mxu1 %v3458_v4  ;;  %2612 = vmatpush3.msra.mxu0 %v1496_v49  ;;  %v2230_v4 = vld [vmem:[%s3930_s9] ss:$0 sm:$0xff] }
 0x274   : > { %2674 = vmatprep.mubr.f32.mxu1 %v3455_v63  ;;  %v1495_v63 = vld [vmem:[%s3931_s10] sm:$0xff] }
 0x275   : > { %2613 = vmatprep.subr.mxu0 %v1495_v63 }
 0x276   : > { %2614 = vmatpush3.msra.mxu0 %v1495_v63 }
 0x277   : > { %2675 = vmatmul.mubr.f32.gmra.mxu1 %v3470_v19 }
 0x278   : > { %2677 = vmatprep.mubr.f32.mxu1 %v3473_v20 }
 0x27b   : > { %2678 = vmatmul.mubr.f32.gmra.mxu1 %v3484_v34 }
 0x27c   : > { %2680 = vmatprep.mubr.f32.mxu1 %v3487_v35 }
 0x27f   : > { %2681 = vmatmul.mubr.f32.gmra.mxu1 %v3498_v44 }
 0x280   : > { %2683 = vmatprep.mubr.f32.mxu1 %v1303_v47 }
 0x283   : > { %2684 = vmatmul.mubr.f32.gmra.mxu1 %v1304_v55 }
 0x284   : > { %2686 = vmatprep.mubr.f32.mxu1 %v1305_v52 }
 0x287   : > { %2687 = vmatmul.mubr.f32.gmra.mxu1 %v1306_v40 }
 0x288   : > { %2689 = vmatprep.mubr.f32.mxu1 %v1307_v0 }
 0x28b   : > { %2690 = vmatmul.mubr.f32.gmra.mxu1 %v1308_v9 }
 0x28c   : > { %2692 = vmatprep.mubr.f32.mxu1 %v1309_v18 }
 0x28f   : > { %2693 = vmatmul.mubr.f32.gmra.mxu1 %v1310_v22 }
 0x313   : > { %v2561_v19 = vpop.f32.mrf.mxu1 }
 0x314   : > { %v1406_v20 = vadd.f32 %v2561_v19, %v2230_v4 }
 0x315   : > { %v1400_v24 = vpop.f32.mrf.mxu1 }
 0x316   : > { %v1401_v26 = vadd.f32 %v2230_v4, %v1400_v24  ;;  %v1480_v36 = vmax.f32 %v1406_v20, 0.0  ;;  %v3562_v24 = vld [vmem:[%s3934_s13] ss:$0 sm:$0xff] }
 0x317   : > { %v2564_v28 = vpop.f32.mrf.mxu1 }
 0x318   : > { %v1479_v32 = vmax.f32 %v1401_v26, 0.0  ;;  %v1416_v33 = vadd.f32 %v2564_v28, %v2230_v4 }
 0x319   : > { %v1410_v34 = vpop.f32.mrf.mxu1 }
 0x31a   : > { %v1411_v35 = vadd.f32 %v2230_v4, %v1410_v34  ;;  %2615 = vmatprep.mubr.f32.mxu0 %v1479_v32  ;;  %v1482_v39 = vmax.f32 %v1416_v33, 0.0 }
 0x31b   : > { %v2567_v37 = vpop.f32.mrf.mxu1  ;;  %2616 = vmatmul.mubr.f32.vlgmr.msra.gmra.mxu0 %v1480_v36 }
 0x31c   : > { %v1481_v23 = vmax.f32 %v1411_v35, 0.0  ;;  %v1426_v41 = vadd.f32 %v2567_v37, %v2230_v4 }
 0x31d   : > { %v1420_v38 = vpop.f32.mrf.mxu1 }
 0x31e   : > { %v1421_v43 = vadd.f32 %v2230_v4, %v1420_v38  ;;  %2618 = vmatprep.mubr.f32.mxu0 %v1481_v23  ;;  %v1484_v50 = vmax.f32 %v1426_v41, 0.0 }
 0x31f   : > { %v2570_v44 = vpop.f32.mrf.mxu1  ;;  %2619 = vmatmul.mubr.f32.gmra.mxu0 %v1482_v39 }
 0x320   : > { %v1483_v47 = vmax.f32 %v1421_v43, 0.0  ;;  %v1436_v51 = vadd.f32 %v2570_v44, %v2230_v4 }
 0x321   : > { %v1430_v54 = vpop.f32.mrf.mxu1 }
 0x322   : > { %v1431_v46 = vadd.f32 %v2230_v4, %v1430_v54  ;;  %2621 = vmatprep.mubr.f32.mxu0 %v1483_v47  ;;  %v1486_v56 = vmax.f32 %v1436_v51, 0.0  ;;  %v698_v54 = vadd.f32 %v3199_v45, %v3220_v5  ;;  %v708_v45 = vadd.f32 %v3205_v53, %v3220_v5 }
 0x323   : > { %v2573_v55 = vpop.f32.mrf.mxu1  ;;  %2622 = vmatmul.mubr.f32.gmra.mxu0 %v1484_v50 }
 0x324   : > { %v1485_v52 = vmax.f32 %v1431_v46, 0.0  ;;  %v1446_v59 = vadd.f32 %v2573_v55, %v2230_v4  ;;  %2788 = vtanh.f32 %v698_v54 }
 0x325   : > { %v1440_v25 = vpop.f32.mrf.mxu1 }
 0x326   : > { %v1441_v6 = vadd.f32 %v2230_v4, %v1440_v25  ;;  %2624 = vmatprep.mubr.f32.mxu0 %v1485_v52  ;;  %v1488_v10 = vmax.f32 %v1446_v59, 0.0 }
 0x327   : > { %v2576_v40 = vpop.f32.mrf.mxu1  ;;  %2625 = vmatmul.mubr.f32.gmra.mxu0 %v1486_v56  ;;  %v693_v56 = vadd.f32 %v3220_v5, %v3201_v48  ;;  %v2864_v48 = vld [vmem:[%s3953_s2] ss:$0 sm:$0xff] }
 0x328   : > { %v1487_v0 = vmax.f32 %v1441_v6, 0.0  ;;  %v1456_v13 = vadd.f32 %v2576_v40, %v2230_v4  ;;  %v718_v5 = vadd.f32 %v2864_v48, %v3211_v61 }
 0x329   : > { %v1450_v16 = vpop.f32.mrf.mxu1  ;;  %2790 = vtanh.f32 %v693_v56 }
 0x32a   : > { %v1451_v17 = vadd.f32 %v2230_v4, %v1450_v16  ;;  %2627 = vmatprep.mubr.f32.mxu0 %v1487_v0  ;;  %v1490_v30 = vmax.f32 %v1456_v13, 0.0  ;;  %v703_v13 = vadd.f32 %v2864_v48, %v3208_v57  ;;  %2792 = vtanh.f32 %v708_v45 }
 0x32b   : > { %v2579_v9 = vpop.f32.mrf.mxu1  ;;  %2628 = vmatmul.mubr.f32.gmra.mxu0 %v1488_v10  ;;  %v713_v57 = vadd.f32 %v2864_v48, %v3214_v2 }
 0x32c   : > { %v1489_v18 = vmax.f32 %v1451_v17, 0.0  ;;  %v1466_v27 = vadd.f32 %v2579_v9, %v2230_v4  ;;  %2794 = vtanh.f32 %v703_v13 }
 0x32d   : > { %v1460_v42 = vpop.f32.mrf.mxu1  ;;  %2796 = vtanh.f32 %v718_v5 }
 0x32e   : > { %v1461_v22 = vadd.f32 %v2230_v4, %v1460_v42  ;;  %2630 = vmatprep.mubr.f32.mxu0 %v1489_v18  ;;  %v1492_v31 = vmax.f32 %v1466_v27, 0.0  ;;  %2798 = vtanh.f32 %v713_v57 }
 0x32f   : > { %v2582_v21 = vpop.f32.mrf.mxu1  ;;  %2631 = vmatmul.mubr.f32.gmra.mxu0 %v1490_v30 }
 0x330   : > { %v1491_v29 = vmax.f32 %v1461_v22, 0.0  ;;  %v1476_v49 = vadd.f32 %v2582_v21, %v2230_v4 }
 0x331   : > { %v1470_v63 = vpop.f32.mrf.mxu1 }
 0x332   : > { %v1471_v19 = vadd.f32 %v2230_v4, %v1470_v63  ;;  %2633 = vmatprep.mubr.f32.mxu0 %v1491_v29  ;;  %v1494_v32 = vmax.f32 %v1476_v49, 0.0 }
 0x333   : > { %2634 = vmatmul.mubr.f32.gmra.mxu0 %v1492_v31  ;;  %v2673_v20 = vpop.f32.mrf.mxu1 }
 0x334   : > { %v1493_v26 = vmax.f32 %v1471_v19, 0.0  ;;  %v1841_v28 = vmul.f32 10.0, %v2673_v20  ;;  %v2789_v19 = vpop.eup %2788 }
 0x335   : > { %v1761_v36 = vpop.f32.mrf.mxu1 }
 0x336   : > { %v1840_v33 = vmul.f32 10.0, %v1761_v36  ;;  %2636 = vmatprep.mubr.f32.mxu0 %v1493_v26  ;;  %v3565_v34 = vadd.f32 %v3562_v24, %v1841_v28 }
 0x337   : > { %2637 = vmatmul.mubr.f32.gmra.mxu0 %v1494_v32  ;;  %v2676_v35 = vpop.f32.mrf.mxu1  ;;  %v2791_v32 = vpop.eup %2790 }
 0x338   : > { %v1843_v4 = vmul.f32 10.0, %v2676_v35  ;;  %1881 = vmax.xlane.f32.xlu1 %v3565_v34  ;;  %v3569_v37 = vadd.f32 %v3562_v24, %v1840_v33  ;;  %v795_v35 = vmul.f32 %v2789_v19, %v3243_v58 }
 0x339   : > { %v1771_v23 = vpop.f32.mrf.mxu1 }
 0x33a   : > { %v1842_v39 = vmul.f32 10.0, %v1771_v23  ;;  %1879 = vmax.xlane.f32.xlu0 %v3569_v37  ;;  %v3573_v41 = vadd.f32 %v3562_v24, %v1843_v4  ;;  %v2793_v4 = vpop.eup %2792 }
 0x33b   : > { %v2679_v38 = vpop.f32.mrf.mxu1 }
 0x33c   : > { %v1845_v43 = vmul.f32 10.0, %v2679_v38  ;;  %1885 = vmax.xlane.f32.xlu1 %v3573_v41  ;;  %v3577_v44 = vadd.f32 %v3562_v24, %v1842_v39  ;;  %v794_v39 = vmul.f32 %v2791_v32, %v3243_v58  ;;  %v2795_v38 = vpop.eup %2794 }
 0x33d   : > { %v1781_v47 = vpop.f32.mrf.mxu1 }
 0x33e   : > { %v1844_v50 = vmul.f32 10.0, %v1781_v47  ;;  %1883 = vmax.xlane.f32.xlu0 %v3577_v44  ;;  %v3581_v51 = vadd.f32 %v3562_v24, %v1845_v43  ;;  %v813_v43 = vsel %vm577_vm0, %v795_v35, 0.0  ;;  %v797_v47 = vmul.f32 %v2793_v4, %v3243_v58 }
 0x33f   : > { %v2682_v46 = vpop.f32.mrf.mxu1  ;;  %v810_v54 = vsel %vm577_vm0, %v794_v39, 0.0 }
 0x340   : > { %v1847_v55 = vmul.f32 10.0, %v2682_v46  ;;  %1889 = vmax.xlane.f32.xlu1 %v3581_v51  ;;  %v3587_v52 = vadd.f32 %v3562_v24, %v1844_v50  ;;  %v2797_v50 = vpop.eup %2796  ;;  %v796_v46 = vmul.f32 %v2795_v38, %v3243_v58 }
 0x341   : > { %v1791_v59 = vpop.f32.mrf.mxu1  ;;  %v799_v56 = vmul.f32 %v2797_v50, %v3243_v58 }
 0x342   : > { %v1846_v25 = vmul.f32 10.0, %v1791_v59  ;;  %1887 = vmax.xlane.f32.xlu0 %v3587_v52  ;;  %v3593_v6 = vadd.f32 %v3562_v24, %v1847_v55  ;;  %v2799_v55 = vpop.eup %2798  ;;  %v816_v59 = vsel %vm577_vm0, %v796_v46, 0.0  ;;  %v3678_v46 = vld [vmem:[%s3932_s11] ss:$0 sm:$0xff] }
 0x343   : > { %v2685_v40 = vpop.f32.mrf.mxu1  ;;  %v825_v45 = vsel %vm577_vm0, %v799_v56, 0.0 }
 0x344   : > { %v1849_v0 = vmul.f32 10.0, %v2685_v40  ;;  %1893 = vmax.xlane.f32.xlu1 %v3593_v6  ;;  %v3599_v10 = vadd.f32 %v3562_v24, %v1846_v25  ;;  %v798_v25 = vmul.f32 %v2799_v55, %v3243_v58 }
 0x345   : > { %v1801_v16 = vpop.f32.mrf.mxu1 }
 0x346   : > { %v1848_v17 = vmul.f32 10.0, %v1801_v16  ;;  %1891 = vmax.xlane.f32.xlu0 %v3599_v10  ;;  %v3607_v53 = vadd.f32 %v3562_v24, %v1849_v0  ;;  %v822_v40 = vsel %vm577_vm0, %v798_v25, 0.0 }
 0x347   : > { %v2688_v9 = vpop.f32.mrf.mxu1 }
 0x348   : > { %v1851_v18 = vmul.f32 10.0, %v2688_v9  ;;  %1897 = vmax.xlane.f32.xlu1 %v3607_v53  ;;  %v3612_v30 = vadd.f32 %v3562_v24, %v1848_v17 }
 0x349   : > { %v1811_v27 = vpop.f32.mrf.mxu1 }
 0x34a   : > { %v1850_v42 = vmul.f32 10.0, %v1811_v27  ;;  %1895 = vmax.xlane.f32.xlu0 %v3612_v30  ;;  %v3617_v22 = vadd.f32 %v3562_v24, %v1851_v18 }
 0x34b   : > { %v2691_v21 = vpop.f32.mrf.mxu1 }
 0x34c   : > { %v1853_v61 = vmul.f32 10.0, %v2691_v21  ;;  %1901 = vmax.xlane.f32.xlu1 %v3617_v22  ;;  %v3621_v29 = vadd.f32 %v3562_v24, %v1850_v42 }
 0x34d   : > { %v1821_v31 = vpop.f32.mrf.mxu1 }
 0x34e   : > { %v1852_v49 = vmul.f32 10.0, %v1821_v31  ;;  %1899 = vmax.xlane.f32.xlu0 %v3621_v29  ;;  %v3625_v2 = vadd.f32 %v3562_v24, %v1853_v61 }
 0x34f   : > { %v2694_v63 = vpop.f32.mrf.mxu1 }
 0x350   : > { %v1855_v20 = vmul.f32 10.0, %v2694_v63  ;;  %1905 = vmax.xlane.f32.xlu1 %v3625_v2  ;;  %v3629_v26 = vadd.f32 %v3562_v24, %v1852_v49 }
 0x351   : > { %v1831_v28 = vpop.f32.mrf.mxu1 }
 0x352   : > { %v1854_v36 = vmul.f32 10.0, %v1831_v28  ;;  %1903 = vmax.xlane.f32.xlu0 %v3629_v26  ;;  %v3633_v33 = vadd.f32 %v3562_v24, %v1855_v20 }
 0x354   : > { %1909 = vmax.xlane.f32.xlu1 %v3633_v33  ;;  %v3638_v23 = vadd.f32 %v3562_v24, %v1854_v36  ;;  %v819_v24 = vsel %vm577_vm0, %v797_v47, 0.0 }
 0x356   : > { %1907 = vmax.xlane.f32.xlu0 %v3638_v23 }
 0x358   : > { %814 = vadd.xlane.f32.xlu1 %v813_v43 }
 0x35a   : > { %811 = vadd.xlane.f32.xlu0 %v810_v54 }
 0x35c   : > { %820 = vadd.xlane.f32.xlu1 %v819_v24 }
 0x35e   : > { %817 = vadd.xlane.f32.xlu0 %v816_v59 }
 0x360   : > { %826 = vadd.xlane.f32.xlu1 %v825_v45 }
 0x362   : > { %823 = vadd.xlane.f32.xlu0 %v822_v40 }
 0x3c1   : > { %v1882_v0 = vpop.xlane.xlu1 %1881 }
 0x3c2   : > { %v1912_v48 = vsub.f32 %v3565_v34, %v1882_v0 }
 0x3c3   : > { %v1880_v13 = vpop.xlane.xlu0 %1879 }
 0x3c4   : > { %v1929_v16 = vmul.f32 1.442695, %v1912_v48  ;;  %v1911_v17 = vsub.f32 %v3569_v37, %v1880_v13 }
 0x3c5   : > { %v1886_v5 = vpop.xlane.xlu1 %1885 }
 0x3c6   : > { %2800 = vpow2.f32 %v1929_v16  ;;  %v1927_v9 = vmul.f32 1.442695, %v1911_v17  ;;  %v1914_v18 = vsub.f32 %v3573_v41, %v1886_v5 }
 0x3c7   : > { %v1884_v58 = vpop.xlane.xlu0 %1883 }
 0x3c8   : > { %2802 = vpow2.f32 %v1927_v9  ;;  %v1933_v57 = vmul.f32 1.442695, %v1914_v18  ;;  %v1913_v27 = vsub.f32 %v3577_v44, %v1884_v58 }
 0x3c9   : > { %v1890_v42 = vpop.xlane.xlu1 %1889 }
 0x3ca   : > { %2804 = vpow2.f32 %v1933_v57  ;;  %v1931_v21 = vmul.f32 1.442695, %v1913_v27  ;;  %v1916_v61 = vsub.f32 %v3581_v51, %v1890_v42 }
 0x3cb   : > { %v1888_v34 = vpop.xlane.xlu0 %1887 }
 0x3cc   : > { %2806 = vpow2.f32 %v1931_v21  ;;  %v1937_v31 = vmul.f32 1.442695, %v1916_v61  ;;  %v1915_v37 = vsub.f32 %v3587_v52, %v1888_v34 }
 0x3cd   : > { %v1894_v49 = vpop.xlane.xlu1 %1893 }
 0x3ce   : > { %2808 = vpow2.f32 %v1937_v31  ;;  %v1935_v63 = vmul.f32 1.442695, %v1915_v37  ;;  %v1918_v41 = vsub.f32 %v3593_v6, %v1894_v49 }
 0x3cf   : > { %v1892_v19 = vpop.xlane.xlu0 %1891 }
 0x3d0   : > { %2810 = vpow2.f32 %v1935_v63  ;;  %v1941_v20 = vmul.f32 1.442695, %v1918_v41  ;;  %v1917_v44 = vsub.f32 %v3599_v10, %v1892_v19 }
 0x3d1   : > { %v1898_v28 = vpop.xlane.xlu1 %1897 }
 0x3d2   : > { %2812 = vpow2.f32 %v1941_v20  ;;  %v1939_v32 = vmul.f32 1.442695, %v1917_v44  ;;  %v1920_v51 = vsub.f32 %v3607_v53, %v1898_v28 }
 0x3d3   : > { %v3661_v36 = vpop.eup %2800  ;;  %v1896_v35 = vpop.xlane.xlu0 %1895 }
 0x3d4   : > { %2814 = vpow2.f32 %v1939_v32  ;;  %v1945_v52 = vmul.f32 1.442695, %v1920_v51  ;;  %v1919_v4 = vsub.f32 %v3612_v30, %v1896_v35  ;;  %1961 = vadd.xlane.f32.xlu1 %v3661_v36 }
 0x3d5   : > { %v3665_v6 = vpop.eup %2802  ;;  %v1902_v39 = vpop.xlane.xlu1 %1901 }
 0x3d6   : > { %2816 = vpow2.f32 %v1945_v52  ;;  %v1943_v38 = vmul.f32 1.442695, %v1919_v4  ;;  %v1922_v10 = vsub.f32 %v3617_v22, %v1902_v39  ;;  %1959 = vadd.xlane.f32.xlu0 %v3665_v6 }
 0x3d7   : > { %v3669_v53 = vpop.eup %2804  ;;  %v1900_v43 = vpop.xlane.xlu0 %1899 }
 0x3d8   : > { %2818 = vpow2.f32 %v1943_v38  ;;  %v1949_v47 = vmul.f32 1.442695, %v1922_v10  ;;  %v1921_v50 = vsub.f32 %v3621_v29, %v1900_v43  ;;  %1965 = vadd.xlane.f32.xlu1 %v3669_v53 }
 0x3d9   : > { %v3673_v30 = vpop.eup %2806  ;;  %v1906_v54 = vpop.xlane.xlu1 %1905 }
 0x3da   : > { %2820 = vpow2.f32 %v1949_v47  ;;  %v1947_v22 = vmul.f32 1.442695, %v1921_v50  ;;  %v1924_v55 = vsub.f32 %v3625_v2, %v1906_v54  ;;  %1963 = vadd.xlane.f32.xlu0 %v3673_v30 }
 0x3db   : > { %v3682_v24 = vpop.eup %2808  ;;  %v2617_v29 = vpop.f32.mrf.mxu0 }
 0x3dc   : > { %v1904_v56 = vpop.xlane.xlu0 %1903  ;;  %2822 = vpow2.f32 %v1947_v22  ;;  %v1953_v59 = vmul.f32 1.442695, %v1924_v55  ;;  %v1590_v25 = vadd.f32 %v2617_v29, %v3678_v46  ;;  %1969 = vadd.xlane.f32.xlu1 %v3682_v24 }
 0x3dd   : > { %v1923_v45 = vsub.f32 %v3629_v26, %v1904_v56  ;;  %v3693_v2 = vpop.eup %2810  ;;  %v1584_v40 = vpop.f32.mrf.mxu0 }
 0x3de   : > { %v1910_v0 = vpop.xlane.xlu1 %1909  ;;  %2824 = vpow2.f32 %v1953_v59  ;;  %1664 = vst.msk [vmem:[%s3688_s17 + $0x8] sm:$0xff] %vm577_vm0, %v1590_v25  ;;  %v1585_v13 = vadd.f32 %v3678_v46, %v1584_v40  ;;  %1967 = vadd.xlane.f32.xlu0 %v3693_v2 }
 0x3df   : > { %v1951_v48 = vmul.f32 1.442695, %v1923_v45  ;;  %v1926_v16 = vsub.f32 %v3633_v33, %v1910_v0  ;;  %v3700_v17 = vpop.eup %2812  ;;  %v2620_v26 = vpop.f32.mrf.mxu0  ;;  %v831_v45 = vsel %vm577_vm0, %v3246_v60, 0.0  ;;  %v837_v60 = vsel %vm577_vm0, %v3252_v1, 0.0 }
 0x3e0   : > { %v1908_v5 = vpop.xlane.xlu0 %1907  ;;  %1663 = vst.msk [vmem:[%s3688_s17] sm:$0xff] %vm577_vm0, %v1585_v13  ;;  %v1600_v33 = vadd.f32 %v2620_v26, %v3678_v46  ;;  %1973 = vadd.xlane.f32.xlu1 %v3700_v17  ;;  %v840_v1 = vsel %vm577_vm0, %v3261_v8, 0.0 }
 0x3e1   : > { %2826 = vpow2.f32 %v1951_v48  ;;  %v1957_v9 = vmul.f32 1.442695, %v1926_v16  ;;  %v1925_v18 = vsub.f32 %v3638_v23, %v1908_v5  ;;  %v3713_v58 = vpop.eup %2814  ;;  %v1594_v57 = vpop.f32.mrf.mxu0  ;;  %v828_v48 = vsel %vm577_vm0, %v3249_v62, 0.0 }
 0x3e2   : > { %v815_v27 = vpop.xlane.xlu1 %814  ;;  %1666 = vst.msk [vmem:[%s3688_s17 + $0x18] sm:$0xff] %vm577_vm0, %v1600_v33  ;;  %v1595_v21 = vadd.f32 %v3678_v46, %v1594_v57  ;;  %1971 = vadd.xlane.f32.xlu0 %v3713_v58  ;;  %v843_v33 = vsel %vm577_vm0, %v3258_v7, 0.0  ;;  %v852_v7 = vsel %vm577_vm0, %v3273_v15, 0.0 }
 0x3e3   : > { %2828 = vpow2.f32 %v1957_v9  ;;  %v1955_v42 = vmul.f32 1.442695, %v1925_v18  ;;  %860 = vst.msk [vmem:[%s3706_s20 + $0x8] sm:$0xff] %vm858_vm1, %v815_v27  ;;  %v3721_v23 = vpop.eup %2816  ;;  %v2623_v61 = vpop.f32.mrf.mxu0  ;;  %v834_v9 = vsel %vm577_vm0, %v3255_v3, 0.0  ;;  %v849_v18 = vsel %vm577_vm0, %v3264_v11, 0.0 }
 0x3e4   : > { %v812_v34 = vpop.xlane.xlu0 %811  ;;  %1665 = vst.msk [vmem:[%s3688_s17 + $0x10] sm:$0xff] %vm577_vm0, %v1595_v21  ;;  %v1610_v31 = vadd.f32 %v2623_v61, %v3678_v46  ;;  %1977 = vadd.xlane.f32.xlu1 %v3721_v23  ;;  %v846_v3 = vsel %vm577_vm0, %v3267_v12, 0.0 }
 0x3e5   : > { %2830 = vpow2.f32 %v1955_v42  ;;  %859 = vst.msk [vmem:[%s3706_s20] sm:$0xff] %vm858_vm1, %v812_v34  ;;  %v3729_v37 = vpop.eup %2818  ;;  %v1604_v49 = vpop.f32.mrf.mxu0 }
 0x3e6   : > { %v821_v63 = vpop.xlane.xlu1 %820  ;;  %1668 = vst.msk [vmem:[%s3688_s17 + $0x28] sm:$0xff] %vm577_vm0, %v1610_v31  ;;  %v1605_v41 = vadd.f32 %v3678_v46, %v1604_v49  ;;  %1975 = vadd.xlane.f32.xlu0 %v3729_v37 }
 0x3e7   : > { %862 = vst.msk [vmem:[%s3706_s20 + $0x18] sm:$0xff] %vm858_vm1, %v821_v63  ;;  %v3737_v19 = vpop.eup %2820  ;;  %v2626_v20 = vpop.f32.mrf.mxu0 }
 0x3e8   : > { %v818_v44 = vpop.xlane.xlu0 %817  ;;  %1667 = vst.msk [vmem:[%s3688_s17 + $0x20] sm:$0xff] %vm577_vm0, %v1605_v41  ;;  %v1620_v28 = vadd.f32 %v2626_v20, %v3678_v46  ;;  %1981 = vadd.xlane.f32.xlu1 %v3737_v19 }
 0x3e9   : > { %861 = vst.msk [vmem:[%s3706_s20 + $0x10] sm:$0xff] %vm858_vm1, %v818_v44  ;;  %v3745_v32 = vpop.eup %2822  ;;  %v1614_v51 = vpop.f32.mrf.mxu0 }
 0x3ea   : > { %v827_v35 = vpop.xlane.xlu1 %826  ;;  %1670 = vst.msk [vmem:[%s3688_s17 + $0x38] sm:$0xff] %vm577_vm0, %v1620_v28  ;;  %v1615_v52 = vadd.f32 %v3678_v46, %v1614_v51  ;;  %1979 = vadd.xlane.f32.xlu0 %v3745_v32 }
 0x3eb   : > { %864 = vst.msk [vmem:[%s3706_s20 + $0x28] sm:$0xff] %vm858_vm1, %v827_v35  ;;  %v3753_v4 = vpop.eup %2824  ;;  %v2629_v39 = vpop.f32.mrf.mxu0 }
 0x3ec   : > { %v824_v38 = vpop.xlane.xlu0 %823  ;;  %1669 = vst.msk [vmem:[%s3688_s17 + $0x30] sm:$0xff] %vm577_vm0, %v1615_v52  ;;  %v1630_v10 = vadd.f32 %v2629_v39, %v3678_v46  ;;  %1985 = vadd.xlane.f32.xlu1 %v3753_v4 }
 0x3ed   : > { %863 = vst.msk [vmem:[%s3706_s20 + $0x20] sm:$0xff] %vm858_vm1, %v824_v38  ;;  %v1624_v47 = vpop.f32.mrf.mxu0 }
 0x3ee   : > { %v3761_v43 = vpop.eup %2826  ;;  %1672 = vst.msk [vmem:[%s3688_s17 + $0x48] sm:$0xff] %vm577_vm0, %v1630_v10  ;;  %v1625_v50 = vadd.f32 %v3678_v46, %v1624_v47 }
 0x3ef   : > { %1983 = vadd.xlane.f32.xlu0 %v3761_v43  ;;  %v2632_v22 = vpop.f32.mrf.mxu0 }
 0x3f0   : > { %v3767_v54 = vpop.eup %2828  ;;  %1671 = vst.msk [vmem:[%s3688_s17 + $0x40] sm:$0xff] %vm577_vm0, %v1625_v50  ;;  %v1640_v55 = vadd.f32 %v2632_v22, %v3678_v46 }
 0x3f1   : > { %1989 = vadd.xlane.f32.xlu1 %v3767_v54  ;;  %v1634_v56 = vpop.f32.mrf.mxu0 }
 0x3f2   : > { %v3773_v29 = vpop.eup %2830  ;;  %1674 = vst.msk [vmem:[%s3688_s17 + $0x58] sm:$0xff] %vm577_vm0, %v1640_v55  ;;  %v1635_v59 = vadd.f32 %v3678_v46, %v1634_v56 }
 0x3f3   : > { %1987 = vadd.xlane.f32.xlu0 %v3773_v29  ;;  %v2635_v25 = vpop.f32.mrf.mxu0 }
 0x3f4   : > { %1673 = vst.msk [vmem:[%s3688_s17 + $0x50] sm:$0xff] %vm577_vm0, %v1635_v59  ;;  %v1650_v40 = vadd.f32 %v2635_v25, %v3678_v46 }
 0x3f5   : > { %832 = vadd.xlane.f32.xlu1 %v831_v45  ;;  %v1644_v0 = vpop.f32.mrf.mxu0 }
 0x3f6   : > { %1676 = vst.msk [vmem:[%s3688_s17 + $0x68] sm:$0xff] %vm577_vm0, %v1650_v40  ;;  %v1645_v13 = vadd.f32 %v3678_v46, %v1644_v0 }
 0x3f7   : > { %829 = vadd.xlane.f32.xlu0 %v828_v48  ;;  %v2638_v16 = vpop.f32.mrf.mxu0 }
 0x3f8   : > { %1675 = vst.msk [vmem:[%s3688_s17 + $0x60] sm:$0xff] %vm577_vm0, %v1645_v13  ;;  %v1660_v26 = vadd.f32 %v2638_v16, %v3678_v46 }
 0x3f9   : > { %838 = vadd.xlane.f32.xlu1 %v837_v60  ;;  %v1654_v5 = vpop.f32.mrf.mxu0 }
 0x3fa   : > { %1678 = vst.msk [vmem:[%s3688_s17 + $0x78] sm:$0xff] %vm577_vm0, %v1660_v26  ;;  %v1655_v62 = vadd.f32 %v3678_v46, %v1654_v5  ;;  %v855_v46 = vsel %vm577_vm0, %v3270_v14, 0.0 }
 0x3fb   : > { %835 = vadd.xlane.f32.xlu0 %v834_v9 }
 0x3fc   : > { %1677 = vst.msk [vmem:[%s3688_s17 + $0x70] sm:$0xff] %vm577_vm0, %v1655_v62 }
 0x3fd   : > { %844 = vadd.xlane.f32.xlu1 %v843_v33 }
 0x3ff   : > { %841 = vadd.xlane.f32.xlu0 %v840_v1 }
 0x401   : > { %850 = vadd.xlane.f32.xlu1 %v849_v18 }
 0x403   : > { %847 = vadd.xlane.f32.xlu0 %v846_v3 }
 0x405   : > { %856 = vadd.xlane.f32.xlu1 %v855_v46 }
 0x407   : > { %853 = vadd.xlane.f32.xlu0 %v852_v7 }
 0x45d   : > { %v1962_v8 = vpop.xlane.xlu1 %1961 }
 0x45e   : > { %2832 = vrcp.f32 %v1962_v8 }
 0x45f   : > { %v1960_v57 = vpop.xlane.xlu0 %1959 }
 0x460   : > { %2834 = vrcp.f32 %v1960_v57 }
 0x461   : > { %v1966_v11 = vpop.xlane.xlu1 %1965 }
 0x462   : > { %2836 = vrcp.f32 %v1966_v11 }
 0x463   : > { %v1964_v27 = vpop.xlane.xlu0 %1963 }
 0x464   : > { %2838 = vrcp.f32 %v1964_v27 }
 0x465   : > { %v1970_v12 = vpop.xlane.xlu1 %1969 }
 0x466   : > { %2840 = vrcp.f32 %v1970_v12 }
 0x467   : > { %v1968_v42 = vpop.xlane.xlu0 %1967 }
 0x468   : > { %2842 = vrcp.f32 %v1968_v42 }
 0x469   : > { %v1974_v14 = vpop.xlane.xlu1 %1973 }
 0x46a   : > { %2844 = vrcp.f32 %v1974_v14 }
 0x46b   : > { %v2833_v21 = vpop.eup %2832  ;;  %v1972_v15 = vpop.xlane.xlu0 %1971 }
 0x46c   : > { %v1994_v61 = vmul.f32 %v2833_v21, %v3661_v36  ;;  %2846 = vrcp.f32 %v1972_v15 }
 0x46d   : > { %v2835_v34 = vpop.eup %2834  ;;  %v1978_v31 = vpop.xlane.xlu1 %1977 }
 0x46e   : > { %2024 = vst [vmem:[%s3817_s30 + $0x8] sm:$0xff] %v1994_v61  ;;  %v1992_v49 = vmul.f32 %v2835_v34, %v3665_v6  ;;  %2848 = vrcp.f32 %v1978_v31 }
 0x46f   : > { %v2837_v63 = vpop.eup %2836  ;;  %v1976_v41 = vpop.xlane.xlu0 %1975 }
 0x470   : > { %2023 = vst [vmem:[%s3817_s30] sm:$0xff] %v1992_v49  ;;  %v1998_v20 = vmul.f32 %v2837_v63, %v3669_v53  ;;  %2850 = vrcp.f32 %v1976_v41 }
 0x471   : > { %v2839_v36 = vpop.eup %2838  ;;  %v1982_v44 = vpop.xlane.xlu1 %1981 }
 0x472   : > { %2026 = vst [vmem:[%s3817_s30 + $0x18] sm:$0xff] %v1998_v20  ;;  %v1996_v28 = vmul.f32 %v2839_v36, %v3673_v30  ;;  %2852 = vrcp.f32 %v1982_v44 }
 0x473   : > { %v2841_v51 = vpop.eup %2840  ;;  %v1980_v35 = vpop.xlane.xlu0 %1979 }
 0x474   : > { %2025 = vst [vmem:[%s3817_s30 + $0x10] sm:$0xff] %v1996_v28  ;;  %v2002_v6 = vmul.f32 %v2841_v51, %v3682_v24  ;;  %2854 = vrcp.f32 %v1980_v35 }
 0x475   : > { %v2843_v52 = vpop.eup %2842  ;;  %v1986_v39 = vpop.xlane.xlu1 %1985 }
 0x476   : > { %2028 = vst [vmem:[%s3817_s30 + $0x28] sm:$0xff] %v2002_v6  ;;  %v2000_v53 = vmul.f32 %v2843_v52, %v3693_v2  ;;  %2856 = vrcp.f32 %v1986_v39 }
 0x477   : > { %v2845_v38 = vpop.eup %2844 }
 0x478   : > { %v1984_v10 = vpop.xlane.xlu0 %1983  ;;  %2027 = vst [vmem:[%s3817_s30 + $0x20] sm:$0xff] %v2000_v53  ;;  %v2006_v30 = vmul.f32 %v2845_v38, %v3700_v17 }
 0x479   : > { %2858 = vrcp.f32 %v1984_v10  ;;  %v2847_v47 = vpop.eup %2846 }
 0x47a   : > { %v1990_v50 = vpop.xlane.xlu1 %1989  ;;  %2030 = vst [vmem:[%s3817_s30 + $0x38] sm:$0xff] %v2006_v30  ;;  %v2004_v24 = vmul.f32 %v2847_v47, %v3713_v58 }
 0x47b   : > { %2860 = vrcp.f32 %v1990_v50  ;;  %v2849_v22 = vpop.eup %2848 }
 0x47c   : > { %v1988_v55 = vpop.xlane.xlu0 %1987  ;;  %2029 = vst [vmem:[%s3817_s30 + $0x30] sm:$0xff] %v2004_v24  ;;  %v2010_v2 = vmul.f32 %v2849_v22, %v3721_v23 }
 0x47d   : > { %2862 = vrcp.f32 %v1988_v55  ;;  %v2851_v56 = vpop.eup %2850 }
 0x47e   : > { %v833_v17 = vpop.xlane.xlu1 %832  ;;  %2032 = vst [vmem:[%s3817_s30 + $0x48] sm:$0xff] %v2010_v2  ;;  %v2008_v59 = vmul.f32 %v2851_v56, %v3729_v37 }
 0x47f   : > { %866 = vst.msk [vmem:[%s3706_s20 + $0x38] sm:$0xff] %vm858_vm1, %v833_v17  ;;  %v2853_v58 = vpop.eup %2852 }
 0x480   : > { %v830_v25 = vpop.xlane.xlu0 %829  ;;  %2031 = vst [vmem:[%s3817_s30 + $0x40] sm:$0xff] %v2008_v59  ;;  %v2014_v45 = vmul.f32 %v2853_v58, %v3737_v19 }
 0x481   : > { %865 = vst.msk [vmem:[%s3706_s20 + $0x30] sm:$0xff] %vm858_vm1, %v830_v25  ;;  %v2855_v23 = vpop.eup %2854 }
 0x482   : > { %v839_v40 = vpop.xlane.xlu1 %838  ;;  %2034 = vst [vmem:[%s3817_s30 + $0x58] sm:$0xff] %v2014_v45  ;;  %v2012_v0 = vmul.f32 %v2855_v23, %v3745_v32 }
 0x483   : > { %868 = vst.msk [vmem:[%s3706_s20 + $0x48] sm:$0xff] %vm858_vm1, %v839_v40  ;;  %v2857_v37 = vpop.eup %2856 }
 0x484   : > { %v836_v48 = vpop.xlane.xlu0 %835  ;;  %2033 = vst [vmem:[%s3817_s30 + $0x50] sm:$0xff] %v2012_v0  ;;  %v2018_v13 = vmul.f32 %v2857_v37, %v3753_v4 }
 0x485   : > { %867 = vst.msk [vmem:[%s3706_s20 + $0x40] sm:$0xff] %vm858_vm1, %v836_v48 }
 0x486   : > { %v2859_v19 = vpop.eup %2858  ;;  %v845_v16 = vpop.xlane.xlu1 %844  ;;  %2036 = vst [vmem:[%s3817_s30 + $0x68] sm:$0xff] %v2018_v13 }
 0x487   : > { %v2016_v60 = vmul.f32 %v2859_v19, %v3761_v43  ;;  %870 = vst.msk [vmem:[%s3706_s20 + $0x58] sm:$0xff] %vm858_vm1, %v845_v16 }
 0x488   : > { %v2861_v32 = vpop.eup %2860  ;;  %v842_v26 = vpop.xlane.xlu0 %841 }
 0x489   : > { %2035 = vst [vmem:[%s3817_s30 + $0x60] sm:$0xff] %v2016_v60  ;;  %v2022_v4 = vmul.f32 %v2861_v32, %v3767_v54  ;;  %869 = vst.msk [vmem:[%s3706_s20 + $0x50] sm:$0xff] %vm858_vm1, %v842_v26 }
 0x48a   : > { %v2863_v5 = vpop.eup %2862  ;;  %v851_v9 = vpop.xlane.xlu1 %850 }
 0x48b   : > { %2038 = vst [vmem:[%s3817_s30 + $0x78] sm:$0xff] %v2022_v4  ;;  %v2020_v43 = vmul.f32 %v2863_v5, %v3773_v29  ;;  %872 = vst.msk [vmem:[%s3706_s20 + $0x68] sm:$0xff] %vm858_vm1, %v851_v9 }
 0x48c   : > { %v848_v54 = vpop.xlane.xlu0 %847 }
 0x48d   : > { %2037 = vst [vmem:[%s3817_s30 + $0x70] sm:$0xff] %v2020_v43  ;;  %871 = vst.msk [vmem:[%s3706_s20 + $0x60] sm:$0xff] %vm858_vm1, %v848_v54 }
 0x48e   : > { %v857_v62 = vpop.xlane.xlu1 %856 }
 0x48f   : > { %2878 = shalt.err (!%p2875_p3)
}
 0x490   : > { %s2879_s23 = scalar_lea.hbm %s3864_s29, 2048  ;;  %s2883_s28 = scalar_lea.hbm %s3936_s15, 4096 }
 0x491   : > { %p2880_p4 = scmp.ne.s32.totalorder %s3864_s29, %s2879_s23  ;;  %p2884_p9 = scmp.lt.s32.totalorder %s3864_s29, %s3936_s15 }
 0x492   : > { %p2885_p10 = scmp.lt.s32.totalorder %s2883_s28, %s2879_s23 }
 0x493   : > { %p2881_p7 = pnand %p2880_p4, %p3053_p5 }
 0x494   : > { %p2886_p11 = por %p2885_p10, %p2884_p9 }
 0x495   : > { %p2882_p8 = pneg %p2881_p7 }
 0x497   : > { %p2887_p12 = pnand %p2886_p11, %p2882_p8 }
 0x499   : > { %2890 = shalt.err (!%p2887_p12)
}
 0x49a   : > { %s2928_s19 = smov 128   ;;  %s2929_s18 = smov 8   ;;  %874 = vst.msk [vmem:[%s3706_s20 + $0x78] sm:$0xff] %vm858_vm1, %v857_v62  ;;  %v854_v29 = vpop.xlane.xlu0 %853 }
 0x49b   : > { %2695 = dma.vmem_to_hbm [thread:$0]  (%p3053_p5), %s3866_s26, 2048, %s3864_s29, %s3877_s25, %s2928_s19, %s2928_s19, %s2929_s18  }
 0x49c   : > { %873 = vst.msk [vmem:[%s3706_s20 + $0x70] sm:$0xff] %vm858_vm1, %v854_v29 }
 0x49d PF: > { %p2701_p13 = scmp.ge.s32.totalorder %s2925_s24, 2  ;;  %s2094_s2 = sand.u32 1, %s2913_s21  }
 0x49e   : > { %s2095_s27 = scalar_lea.sflag [#allocation3], %s2094_s2 }
 0x49f   : > { %p2698_p0 = pnand %p2701_p13, %p3057_p6 }
 0x4a1   : > { %p2699_p1 = pneg %p2698_p0 }
 0x4a3   : > { %2908 = dma.done.wait (%p2699_p1), %s2095_s27, 2048  }
 0x4a4   : > { %2910 = vsyncadd (%p2699_p1), %s2095_s27, 4294965248  ;;  %s3955_s24 = sld [smem:[#allocation6_spill]]  ;;  %s3958_s21 = smov %s2917_s22 }
 0x4a5   : > { %s3956_s0 = sld [smem:[#allocation5_spill]] }
 0x4a6   : > { %s3957_s23 = sld [smem:[#allocation7_spill]] }
 0x4aa   : > { %p27_p5 = scmp.ge.s32.totalorder %s3955_s24, 4  }
 0x4ab   : > { %s3959_s22 = smov %s3956_s0 }
 0x4ac   :  { %29 = sbr.rel (!%p27_p5) target bundleno = 7 (0x7), region = 135 }
 0x4b1   :  { %2108 = vsyncpa [#allocation3], 1 }
 0x4b2   :  { %2110 = vsyncpa [#allocation3 + $0x1], 1 }

</bundles_post_ra>
